<compile_context>
chip_gen: v7x
topology: tpu7x:2x2x1
jax: 0.10.0
libtpu: 0.0.40
codegen_flags: <defaults>
</compile_context>

<pallas_src>
import jax
import jax.numpy as jnp
import numpy as np
from jax import lax
from jax.experimental import pallas as pl
from jax.experimental.pallas import tpu as pltpu

EPS = 1e-5


# ---------------------------------------------------------------------------
# in-kernel helpers
# ---------------------------------------------------------------------------
def _shift_w(x, dw):
    """y[:, w] = x[:, w + dw] with zero fill at the W boundary (dw in {-1,0,1})."""
    if dw == 0:
        return x
    zcol = jnp.zeros_like(x[:, :1])
    if dw > 0:
        return jnp.concatenate([x[:, dw:], zcol], axis=1)
    return jnp.concatenate([zcol, x[:, :dw]], axis=1)


def _conv3x3_chunk(slab, w_ref):
    """3x3 'same' conv (W direction) on one H-chunk.

    slab  : (CH+2, W, Cin) f32 — chunk rows plus one halo row above/below,
            halo rows already zeroed where they fall outside the image.
    w_ref : (3, 3*Cin, Cout) bf16 ref, outer index = kw, inner rows kh-major
            then cin.
    returns (CH, W, Cout) f32 — three accumulated MXU matmuls with K = 3*Cin.
    """
    ch = slab.shape[0] - 2
    xb = slab.astype(jnp.bfloat16)
    # rows[h, w, kh*Cin + c] = slab[h + kh, w, c]  (kh in {0,1,2})
    rows = jnp.concatenate([xb[:ch], xb[1:ch + 1], xb[2:ch + 2]], axis=-1)
    acc = None
    for kw in range(3):
        shifted = _shift_w(rows, kw - 1)            # W halo: zero fill
        part = jnp.einsum("hwk,ko->hwo", shifted, w_ref[kw],
                          preferred_element_type=jnp.float32)
        acc = part if acc is None else acc + part
    return acc


def _load_halo(img_ref, hs, ch, h_total):
    """Load rows [hs-1, hs+ch+1) of an (H, W, C) ref.

    Out-of-range halo rows are loaded from a clamped index; the caller zeroes
    them (before or after pointwise transforms) using the returned flags.
    Returns (top(1,W,C), body(ch,W,C), bot(1,W,C), top_is_pad, bot_is_pad).
    """
    body = img_ref[pl.ds(hs, ch)].astype(jnp.float32)
    top = img_ref[pl.ds(jnp.maximum(hs - 1, 0), 1)].astype(jnp.float32)
    bot = img_ref[pl.ds(jnp.minimum(hs + ch, h_total - 1), 1)].astype(jnp.float32)
    return top, body, bot, hs == 0, (hs + ch) >= h_total


def _build_kernel(H, W, C, CH):
    n_chunks = H // CH
    inv_hw = 1.0 / float(H * W)

    def kernel(x_ref, w1_ref, w2_ref, o_ref, c1_ref, c2_ref):
        # x_ref/o_ref: (H, W, C) (batch dim squeezed by BlockSpec)
        # w1_ref/w2_ref: (3, 3C, C) bf16
        # c1_ref/c2_ref: (H, W, C) f32 scratch (raw conv outputs)
        zero_c = jnp.zeros((1, 1, C), jnp.float32)

        # ---- pass 1: conv1 over H-chunks -> c1 scratch; fused IN1 stats ----
        def p1(ci, carry):
            s, ss = carry
            hs = pl.multiple_of(ci * CH, CH)
            top, body, bot, tp, bp = _load_halo(x_ref, hs, CH, H)
            top = jnp.where(tp, 0.0, top)           # conv zero padding in H
            bot = jnp.where(bp, 0.0, bot)
            y = _conv3x3_chunk(jnp.concatenate([top, body, bot], axis=0),
                               w1_ref)
            c1_ref[pl.ds(hs, CH)] = y
            return (s + jnp.sum(y, axis=(0, 1), keepdims=True),
                    ss + jnp.sum(y * y, axis=(0, 1), keepdims=True))

        s1, ss1 = lax.fori_loop(0, n_chunks, p1, (zero_c, zero_c))
        mean1 = s1 * inv_hw
        inv1 = lax.rsqrt(jnp.maximum(ss1 * inv_hw - mean1 * mean1, 0.0) + EPS)

        # ---- pass 2: IN1+ReLU on the fly, conv2 -> c2 scratch; IN2 stats ----
        def p2(ci, carry):
            s, ss = carry
            hs = pl.multiple_of(ci * CH, CH)
            top, body, bot, tp, bp = _load_halo(c1_ref, hs, CH, H)
            nrm = lambda v: jnp.maximum((v - mean1) * inv1, 0.0)
            # zero AFTER normalize+relu: conv2 pads y1 (post-IN/ReLU) with 0
            top = jnp.where(tp, 0.0, nrm(top))
            bot = jnp.where(bp, 0.0, nrm(bot))
            y = _conv3x3_chunk(jnp.concatenate([top, nrm(body), bot], axis=0),
                               w2_ref)
            c2_ref[pl.ds(hs, CH)] = y
            return (s + jnp.sum(y, axis=(0, 1), keepdims=True),
                    ss + jnp.sum(y * y, axis=(0, 1), keepdims=True))

        s2, ss2 = lax.fori_loop(0, n_chunks, p2, (zero_c, zero_c))
        mean2 = s2 * inv_hw
        inv2 = lax.rsqrt(jnp.maximum(ss2 * inv_hw - mean2 * mean2, 0.0) + EPS)

        # ---- pass 3: IN2 + ReLU + residual add, chunked writeback ----
        @pl.loop(0, n_chunks)
        def _(ci):
            hs = pl.multiple_of(ci * CH, CH)
            y2 = jnp.maximum((c2_ref[pl.ds(hs, CH)] - mean2) * inv2, 0.0)
            xc = x_ref[pl.ds(hs, CH)].astype(jnp.float32)
            o_ref[pl.ds(hs, CH)] = (y2 + xc).astype(o_ref.dtype)

    return kernel


# ---------------------------------------------------------------------------
# wrapper-side helpers
# ---------------------------------------------------------------------------
def _flatten_weight(w_hwio):
    """(3, 3, Cin, Cout) HWIO -> (3, 3*Cin, Cout) bf16.

    Outer index = kw; inner rows ordered kh-major then cin — matching the
    rows construction in _conv3x3_chunk."""
    kh, kw, cin, cout = w_hwio.shape
    return (jnp.transpose(w_hwio, (1, 0, 2, 3))
            .reshape(kw, kh * cin, cout)
            .astype(jnp.bfloat16))


def _pick_chunk_h(H, W, C):
    """Largest divisor of H keeping the per-chunk bf16 rows slab <= ~2 MiB."""
    row_bytes = W * 3 * C * 2
    target = max(4, min(H, (2 << 20) // max(row_bytes, 1)))
    for ch in range(int(target), 0, -1):
        if H % ch == 0:
            return ch
    return H


def _vmem_limit_bytes(H, W, C, CH):
    f32 = 4
    img = H * W * C * f32
    io = 2 * 2 * img                        # double-buffered in + out blocks
    wts = 2 * 2 * (3 * 3 * C * C * 2)       # two bf16 weight slabs (2 bufs each)
    scratch = 2 * img                       # c1 + c2 f32 scratch
    chunk = ((CH + 2) * W * C * f32         # halo slab
             + CH * W * 3 * C * 2           # bf16 rows
             + 3 * CH * W * C * f32)        # conv acc + shifted-copy headroom
    est = int((io + wts + scratch + chunk) * 1.25)
    # floor at the default scoped limit; stay comfortably under v7x's 64 MiB
    return min(max(est, 32 * 1024 * 1024), 56 * 1024 * 1024)


def residual_forward(x_nhwc, w1_hwio, w2_hwio):
    """x_nhwc: (N, H, W, C). Returns (N, H, W, C)."""
    N, H, W, C = x_nhwc.shape
    ch = _pick_chunk_h(H, W, C)
    w1f = _flatten_weight(w1_hwio)
    w2f = _flatten_weight(w2_hwio)
    kernel = _build_kernel(H, W, C, ch)

    # NOTE: weight index_maps are constant across the grid, so Pallas does not
    # re-issue their DMA per step; only the extra buffer allocation remains.
    return pl.pallas_call(
        kernel,
        out_shape=jax.ShapeDtypeStruct((N, H, W, C), x_nhwc.dtype),
        grid_spec=pltpu.PrefetchScalarGridSpec(
            num_scalar_prefetch=0,
            grid=(N,),
            in_specs=[
                pl.BlockSpec((None, H, W, C), lambda n: (n, 0, 0, 0)),
                pl.BlockSpec((3, 3 * C, C), lambda n: (0, 0, 0)),
                pl.BlockSpec((3, 3 * C, C), lambda n: (0, 0, 0)),
            ],
            out_specs=pl.BlockSpec((None, H, W, C), lambda n: (n, 0, 0, 0)),
            scratch_shapes=[
                pltpu.VMEM((H, W, C), jnp.float32),   # raw conv1 output
                pltpu.VMEM((H, W, C), jnp.float32),   # raw conv2 output
            ],
        ),
        compiler_params=pltpu.CompilerParams(
            dimension_semantics=("parallel",),
            vmem_limit_bytes=_vmem_limit_bytes(H, W, C, ch)),
    )(x_nhwc, w1f, w2f)


# ---------------------------------------------------------------------------
# Pure-JAX reference (mirrors the PyTorch module; conv operands cast to bf16
# with f32 accumulation, matching the kernel's MXU numerics).
# ---------------------------------------------------------------------------
def _ref_rblock(x, w):
    y = lax.conv_general_dilated(
        x.astype(jnp.bfloat16), w.astype(jnp.bfloat16),
        window_strides=(1, 1), padding="SAME",
        dimension_numbers=("NHWC", "HWIO", "NHWC"),
        preferred_element_type=jnp.float32)
    mean = jnp.mean(y, axis=(1, 2), keepdims=True)
    var = jnp.mean((y - mean) ** 2, axis=(1, 2), keepdims=True)
    return jnp.maximum((y - mean) * lax.rsqrt(var + EPS), 0.0)


def _ref_residual(x, w1, w2):
    return _ref_rblock(_ref_rblock(x, w1), w2) + x


if __name__ == "__main__":
    N, C, H, W = 2, 4, 16, 16   # PyTorch input would be NCHW (2, 4, 16, 16)

    key = jax.random.PRNGKey(0)
    kx, k1, k2 = jax.random.split(key, 3)

    # inputs generated directly in NHWC kernel layout
    x = jax.random.normal(kx, (N, H, W, C), dtype=jnp.float32)
    # deterministic conv weights (HWIO), kaiming-ish scale
    fan_in = 3 * 3 * C
    w1 = jax.random.normal(k1, (3, 3, C, C), dtype=jnp.float32) / np.sqrt(fan_in)
    w2 = jax.random.normal(k2, (3, 3, C, C), dtype=jnp.float32) / np.sqrt(fan_in)

    out = jax.block_until_ready(residual_forward(x, w1, w2))
    ref = jax.block_until_ready(_ref_residual(x, w1, w2))

    assert out.shape == (N, H, W, C)
    np.testing.assert_allclose(np.asarray(out), np.asarray(ref),
                               atol=5e-3, rtol=5e-3)

    print("KERNEL_OK")
</pallas_src>

<mosaic_0001>
module attributes {stable_mosaic.version = 11 : i64} {
  func.func @kernel(%arg0: i32, %arg1: memref<1x16x16x4xf32, #tpu.memory_space<vmem>>, %arg2: memref<3x12x4xbf16, #tpu.memory_space<vmem>>, %arg3: memref<3x12x4xbf16, #tpu.memory_space<vmem>>, %arg4: memref<1x16x16x4xf32, #tpu.memory_space<vmem>>, %arg5: memref<16x16x4xf32, #tpu.memory_space<vmem>>, %arg6: memref<16x16x4xf32, #tpu.memory_space<vmem>>) attributes {dimension_semantics = [#tpu.dimension_semantics<parallel>], iteration_bounds = array<i64: 2>, scalar_prefetch = 0 : i64, scratch_operands = 2 : i64, tpu.core_type = #tpu.core_type<tc>, window_params = [{transform_indices = @transform_0, window_bounds = array<i64: 1, 16, 16, 4>}, {pipeline_mode = #tpu.pipeline_mode<synchronous>, transform_indices = @transform_1, window_bounds = array<i64: 3, 12, 4>}, {pipeline_mode = #tpu.pipeline_mode<synchronous>, transform_indices = @transform_2, window_bounds = array<i64: 3, 12, 4>}, {transform_indices = @transform_3, window_bounds = array<i64: 1, 16, 16, 4>}]} {
    %cst = arith.constant 0.000000e+00 : f32
    %0 = vector.broadcast %cst : f32 to vector<1x1x4xf32>
    %c0_i32 = arith.constant 0 : i32
    %c16_i32 = arith.constant 16 : i32
    %1 = arith.muli %c0_i32, %c16_i32 : i32
    %2 = tpu.assume_multiple %1, 16 : i32
    %c0 = arith.constant 0 : index
    %3 = arith.index_cast %2 : i32 to index
    %c0_0 = arith.constant 0 : index
    %c0_1 = arith.constant 0 : index
    %4 = vector.load %arg1[%c0, %3, %c0_0, %c0_1] : memref<1x16x16x4xf32, #tpu.memory_space<vmem>>, vector<1x16x16x4xf32>
    %5 = vector.shape_cast %4 : vector<1x16x16x4xf32> to vector<16x16x4xf32>
    %c1_i32 = arith.constant 1 : i32
    %6 = arith.subi %2, %c1_i32 : i32
    %c0_i32_2 = arith.constant 0 : i32
    %7 = arith.maxsi %6, %c0_i32_2 : i32
    %c0_3 = arith.constant 0 : index
    %8 = arith.index_cast %7 : i32 to index
    %c0_4 = arith.constant 0 : index
    %c0_5 = arith.constant 0 : index
    %9 = vector.load %arg1[%c0_3, %8, %c0_4, %c0_5] : memref<1x16x16x4xf32, #tpu.memory_space<vmem>>, vector<1x1x16x4xf32>
    %10 = vector.shape_cast %9 : vector<1x1x16x4xf32> to vector<1x16x4xf32>
    %c16_i32_6 = arith.constant 16 : i32
    %11 = arith.addi %2, %c16_i32_6 : i32
    %c15_i32 = arith.constant 15 : i32
    %12 = arith.minsi %11, %c15_i32 : i32
    %c0_7 = arith.constant 0 : index
    %13 = arith.index_cast %12 : i32 to index
    %c0_8 = arith.constant 0 : index
    %c0_9 = arith.constant 0 : index
    %14 = vector.load %arg1[%c0_7, %13, %c0_8, %c0_9] : memref<1x16x16x4xf32, #tpu.memory_space<vmem>>, vector<1x1x16x4xf32>
    %15 = vector.shape_cast %14 : vector<1x1x16x4xf32> to vector<1x16x4xf32>
    %c0_i32_10 = arith.constant 0 : i32
    %16 = arith.cmpi eq, %2, %c0_i32_10 : i32
    %c16_i32_11 = arith.constant 16 : i32
    %17 = arith.addi %2, %c16_i32_11 : i32
    %c16_i32_12 = arith.constant 16 : i32
    %18 = arith.cmpi sge, %17, %c16_i32_12 : i32
    %cst_13 = arith.constant 0.000000e+00 : f32
    %19 = vector.broadcast %cst_13 : f32 to vector<1x16x4xf32>
    %20 = arith.select %16, %19, %10 : vector<1x16x4xf32>
    %cst_14 = arith.constant 0.000000e+00 : f32
    %21 = vector.broadcast %cst_14 : f32 to vector<1x16x4xf32>
    %22 = arith.select %18, %21, %15 : vector<1x16x4xf32>
    %23 = tpu.concatenate %20, %5, %22 in 0 : vector<1x16x4xf32>, vector<16x16x4xf32>, vector<1x16x4xf32> -> vector<18x16x4xf32>
    %24 = arith.truncf %23 : vector<18x16x4xf32> to vector<18x16x4xbf16>
    %25 = vector.extract_strided_slice %24 {offsets = [0, 0, 0], sizes = [16, 16, 4], strides = [1, 1, 1]} : vector<18x16x4xbf16> to vector<16x16x4xbf16>
    %26 = vector.extract_strided_slice %24 {offsets = [1, 0, 0], sizes = [16, 16, 4], strides = [1, 1, 1]} : vector<18x16x4xbf16> to vector<16x16x4xbf16>
    %27 = vector.extract_strided_slice %24 {offsets = [2, 0, 0], sizes = [16, 16, 4], strides = [1, 1, 1]} : vector<18x16x4xbf16> to vector<16x16x4xbf16>
    %28 = tpu.concatenate %25, %26, %27 in 2 : vector<16x16x4xbf16>, vector<16x16x4xbf16>, vector<16x16x4xbf16> -> vector<16x16x12xbf16>
    %cst_15 = arith.constant 0.000000e+00 : bf16
    %29 = vector.broadcast %cst_15 : bf16 to vector<16x1x12xbf16>
    %30 = vector.extract_strided_slice %28 {offsets = [0, 0, 0], sizes = [16, 15, 12], strides = [1, 1, 1]} : vector<16x16x12xbf16> to vector<16x15x12xbf16>
    %31 = tpu.concatenate %29, %30 in 1 : vector<16x1x12xbf16>, vector<16x15x12xbf16> -> vector<16x16x12xbf16>
    %c0_16 = arith.constant 0 : index
    %c0_17 = arith.constant 0 : index
    %c0_18 = arith.constant 0 : index
    %32 = vector.load %arg2[%c0_16, %c0_17, %c0_18] : memref<3x12x4xbf16, #tpu.memory_space<vmem>>, vector<1x12x4xbf16>
    %33 = vector.shape_cast %32 : vector<1x12x4xbf16> to vector<12x4xbf16>
    "tpu.trace_start"() <{level = 10 : i32, message = "hwk,ko->hwo"}> : () -> ()
    %cst_19 = arith.constant dense<0.000000e+00> : vector<16x16x4xf32>
    %34 = tpu.matmul %31, %33, %cst_19 {dimension_numbers = #tpu.dot_dimension_numbers<[2], [0], [0, 1], [1], [0, 0, 0, 1, 1, 1], [], []>} : vector<16x16x12xbf16>, vector<12x4xbf16>, vector<16x16x4xf32> -> vector<16x16x4xf32>
    "tpu.trace_stop"() : () -> ()
    %c1 = arith.constant 1 : index
    %c0_20 = arith.constant 0 : index
    %c0_21 = arith.constant 0 : index
    %35 = vector.load %arg2[%c1, %c0_20, %c0_21] : memref<3x12x4xbf16, #tpu.memory_space<vmem>>, vector<1x12x4xbf16>
    %36 = vector.shape_cast %35 : vector<1x12x4xbf16> to vector<12x4xbf16>
    "tpu.trace_start"() <{level = 10 : i32, message = "hwk,ko->hwo"}> : () -> ()
    %cst_22 = arith.constant dense<0.000000e+00> : vector<16x16x4xf32>
    %37 = tpu.matmul %28, %36, %cst_22 {dimension_numbers = #tpu.dot_dimension_numbers<[2], [0], [0, 1], [1], [0, 0, 0, 1, 1, 1], [], []>} : vector<16x16x12xbf16>, vector<12x4xbf16>, vector<16x16x4xf32> -> vector<16x16x4xf32>
    "tpu.trace_stop"() : () -> ()
    %38 = arith.addf %34, %37 : vector<16x16x4xf32>
    %cst_23 = arith.constant 0.000000e+00 : bf16
    %39 = vector.broadcast %cst_23 : bf16 to vector<16x1x12xbf16>
    %40 = vector.extract_strided_slice %28 {offsets = [0, 1, 0], sizes = [16, 15, 12], strides = [1, 1, 1]} : vector<16x16x12xbf16> to vector<16x15x12xbf16>
    %41 = tpu.concatenate %40, %39 in 1 : vector<16x15x12xbf16>, vector<16x1x12xbf16> -> vector<16x16x12xbf16>
    %c2 = arith.constant 2 : index
    %c0_24 = arith.constant 0 : index
    %c0_25 = arith.constant 0 : index
    %42 = vector.load %arg2[%c2, %c0_24, %c0_25] : memref<3x12x4xbf16, #tpu.memory_space<vmem>>, vector<1x12x4xbf16>
    %43 = vector.shape_cast %42 : vector<1x12x4xbf16> to vector<12x4xbf16>
    "tpu.trace_start"() <{level = 10 : i32, message = "hwk,ko->hwo"}> : () -> ()
    %cst_26 = arith.constant dense<0.000000e+00> : vector<16x16x4xf32>
    %44 = tpu.matmul %41, %43, %cst_26 {dimension_numbers = #tpu.dot_dimension_numbers<[2], [0], [0, 1], [1], [0, 0, 0, 1, 1, 1], [], []>} : vector<16x16x12xbf16>, vector<12x4xbf16>, vector<16x16x4xf32> -> vector<16x16x4xf32>
    "tpu.trace_stop"() : () -> ()
    %45 = arith.addf %38, %44 : vector<16x16x4xf32>
    %46 = arith.index_cast %2 : i32 to index
    %c0_27 = arith.constant 0 : index
    %c0_28 = arith.constant 0 : index
    %47 = vector.load %arg5[%46, %c0_27, %c0_28] : memref<16x16x4xf32, #tpu.memory_space<vmem>>, vector<16x16x4xf32>
    tpu.vector_store %arg5[%46, %c0_27, %c0_28], %45 {strides = array<i32>} : memref<16x16x4xf32, #tpu.memory_space<vmem>>, vector<16x16x4xf32>,
    %cst_29 = arith.constant dense<0.000000e+00> : vector<4xf32>
    %48 = vector.multi_reduction <add>, %45, %cst_29 [0, 1] : vector<16x16x4xf32> to vector<4xf32>
    %49 = vector.shape_cast %48 : vector<4xf32> to vector<1x1x4xf32>
    %50 = arith.addf %0, %49 : vector<1x1x4xf32>
    %51 = arith.mulf %45, %45 : vector<16x16x4xf32>
    %cst_30 = arith.constant dense<0.000000e+00> : vector<4xf32>
    %52 = vector.multi_reduction <add>, %51, %cst_30 [0, 1] : vector<16x16x4xf32> to vector<4xf32>
    %53 = vector.shape_cast %52 : vector<4xf32> to vector<1x1x4xf32>
    %54 = arith.addf %0, %53 : vector<1x1x4xf32>
    %c1_i32_31 = arith.constant 1 : i32
    %cst_32 = arith.constant 3.906250e-03 : f32
    %55 = vector.broadcast %cst_32 : f32 to vector<1x1x4xf32>
    %56 = arith.mulf %50, %55 : vector<1x1x4xf32>
    %cst_33 = arith.constant 3.906250e-03 : f32
    %57 = vector.broadcast %cst_33 : f32 to vector<1x1x4xf32>
    %58 = arith.mulf %54, %57 : vector<1x1x4xf32>
    %59 = arith.mulf %56, %56 : vector<1x1x4xf32>
    %60 = arith.subf %58, %59 : vector<1x1x4xf32>
    %cst_34 = arith.constant 0.000000e+00 : f32
    %61 = vector.broadcast %cst_34 : f32 to vector<1x1x4xf32>
    %62 = arith.maximumf %60, %61 : vector<1x1x4xf32>
    %cst_35 = arith.constant 9.99999974E-6 : f32
    %63 = vector.broadcast %cst_35 : f32 to vector<1x1x4xf32>
    %64 = arith.addf %62, %63 : vector<1x1x4xf32>
    %65 = math.rsqrt %64 : vector<1x1x4xf32>
    %c0_i32_36 = arith.constant 0 : i32
    %c16_i32_37 = arith.constant 16 : i32
    %66 = arith.muli %c0_i32_36, %c16_i32_37 : i32
    %67 = tpu.assume_multiple %66, 16 : i32
    %68 = arith.index_cast %67 : i32 to index
    %c0_38 = arith.constant 0 : index
    %c0_39 = arith.constant 0 : index
    %69 = vector.load %arg5[%68, %c0_38, %c0_39] : memref<16x16x4xf32, #tpu.memory_space<vmem>>, vector<16x16x4xf32>
    %c1_i32_40 = arith.constant 1 : i32
    %70 = arith.subi %67, %c1_i32_40 : i32
    %c0_i32_41 = arith.constant 0 : i32
    %71 = arith.maxsi %70, %c0_i32_41 : i32
    %72 = arith.index_cast %71 : i32 to index
    %c0_42 = arith.constant 0 : index
    %c0_43 = arith.constant 0 : index
    %73 = vector.load %arg5[%72, %c0_42, %c0_43] : memref<16x16x4xf32, #tpu.memory_space<vmem>>, vector<1x16x4xf32>
    %c16_i32_44 = arith.constant 16 : i32
    %74 = arith.addi %67, %c16_i32_44 : i32
    %c15_i32_45 = arith.constant 15 : i32
    %75 = arith.minsi %74, %c15_i32_45 : i32
    %76 = arith.index_cast %75 : i32 to index
    %c0_46 = arith.constant 0 : index
    %c0_47 = arith.constant 0 : index
    %77 = vector.load %arg5[%76, %c0_46, %c0_47] : memref<16x16x4xf32, #tpu.memory_space<vmem>>, vector<1x16x4xf32>
    %c0_i32_48 = arith.constant 0 : i32
    %78 = arith.cmpi eq, %67, %c0_i32_48 : i32
    %c16_i32_49 = arith.constant 16 : i32
    %79 = arith.addi %67, %c16_i32_49 : i32
    %c16_i32_50 = arith.constant 16 : i32
    %80 = arith.cmpi sge, %79, %c16_i32_50 : i32
    %81 = vector.broadcast %56 : vector<1x1x4xf32> to vector<1x16x4xf32>
    %82 = arith.subf %73, %81 : vector<1x16x4xf32>
    %83 = vector.broadcast %65 : vector<1x1x4xf32> to vector<1x16x4xf32>
    %84 = arith.mulf %82, %83 : vector<1x16x4xf32>
    %cst_51 = arith.constant 0.000000e+00 : f32
    %85 = vector.broadcast %cst_51 : f32 to vector<1x16x4xf32>
    %86 = arith.maximumf %84, %85 : vector<1x16x4xf32>
    %cst_52 = arith.constant 0.000000e+00 : f32
    %87 = vector.broadcast %cst_52 : f32 to vector<1x16x4xf32>
    %88 = arith.select %78, %87, %86 : vector<1x16x4xf32>
    %89 = vector.broadcast %56 : vector<1x1x4xf32> to vector<1x16x4xf32>
    %90 = arith.subf %77, %89 : vector<1x16x4xf32>
    %91 = vector.broadcast %65 : vector<1x1x4xf32> to vector<1x16x4xf32>
    %92 = arith.mulf %90, %91 : vector<1x16x4xf32>
    %cst_53 = arith.constant 0.000000e+00 : f32
    %93 = vector.broadcast %cst_53 : f32 to vector<1x16x4xf32>
    %94 = arith.maximumf %92, %93 : vector<1x16x4xf32>
    %cst_54 = arith.constant 0.000000e+00 : f32
    %95 = vector.broadcast %cst_54 : f32 to vector<1x16x4xf32>
    %96 = arith.select %80, %95, %94 : vector<1x16x4xf32>
    %97 = vector.broadcast %56 : vector<1x1x4xf32> to vector<16x16x4xf32>
    %98 = arith.subf %69, %97 : vector<16x16x4xf32>
    %99 = vector.broadcast %65 : vector<1x1x4xf32> to vector<16x16x4xf32>
    %100 = arith.mulf %98, %99 : vector<16x16x4xf32>
    %cst_55 = arith.constant 0.000000e+00 : f32
    %101 = vector.broadcast %cst_55 : f32 to vector<16x16x4xf32>
    %102 = arith.maximumf %100, %101 : vector<16x16x4xf32>
    %103 = tpu.concatenate %88, %102, %96 in 0 : vector<1x16x4xf32>, vector<16x16x4xf32>, vector<1x16x4xf32> -> vector<18x16x4xf32>
    %104 = arith.truncf %103 : vector<18x16x4xf32> to vector<18x16x4xbf16>
    %105 = vector.extract_strided_slice %104 {offsets = [0, 0, 0], sizes = [16, 16, 4], strides = [1, 1, 1]} : vector<18x16x4xbf16> to vector<16x16x4xbf16>
    %106 = vector.extract_strided_slice %104 {offsets = [1, 0, 0], sizes = [16, 16, 4], strides = [1, 1, 1]} : vector<18x16x4xbf16> to vector<16x16x4xbf16>
    %107 = vector.extract_strided_slice %104 {offsets = [2, 0, 0], sizes = [16, 16, 4], strides = [1, 1, 1]} : vector<18x16x4xbf16> to vector<16x16x4xbf16>
    %108 = tpu.concatenate %105, %106, %107 in 2 : vector<16x16x4xbf16>, vector<16x16x4xbf16>, vector<16x16x4xbf16> -> vector<16x16x12xbf16>
    %cst_56 = arith.constant 0.000000e+00 : bf16
    %109 = vector.broadcast %cst_56 : bf16 to vector<16x1x12xbf16>
    %110 = vector.extract_strided_slice %108 {offsets = [0, 0, 0], sizes = [16, 15, 12], strides = [1, 1, 1]} : vector<16x16x12xbf16> to vector<16x15x12xbf16>
    %111 = tpu.concatenate %109, %110 in 1 : vector<16x1x12xbf16>, vector<16x15x12xbf16> -> vector<16x16x12xbf16>
    %c0_57 = arith.constant 0 : index
    %c0_58 = arith.constant 0 : index
    %c0_59 = arith.constant 0 : index
    %112 = vector.load %arg3[%c0_57, %c0_58, %c0_59] : memref<3x12x4xbf16, #tpu.memory_space<vmem>>, vector<1x12x4xbf16>
    %113 = vector.shape_cast %112 : vector<1x12x4xbf16> to vector<12x4xbf16>
    "tpu.trace_start"() <{level = 10 : i32, message = "hwk,ko->hwo"}> : () -> ()
    %cst_60 = arith.constant dense<0.000000e+00> : vector<16x16x4xf32>
    %114 = tpu.matmul %111, %113, %cst_60 {dimension_numbers = #tpu.dot_dimension_numbers<[2], [0], [0, 1], [1], [0, 0, 0, 1, 1, 1], [], []>} : vector<16x16x12xbf16>, vector<12x4xbf16>, vector<16x16x4xf32> -> vector<16x16x4xf32>
    "tpu.trace_stop"() : () -> ()
    %c1_61 = arith.constant 1 : index
    %c0_62 = arith.constant 0 : index
    %c0_63 = arith.constant 0 : index
    %115 = vector.load %arg3[%c1_61, %c0_62, %c0_63] : memref<3x12x4xbf16, #tpu.memory_space<vmem>>, vector<1x12x4xbf16>
    %116 = vector.shape_cast %115 : vector<1x12x4xbf16> to vector<12x4xbf16>
    "tpu.trace_start"() <{level = 10 : i32, message = "hwk,ko->hwo"}> : () -> ()
    %cst_64 = arith.constant dense<0.000000e+00> : vector<16x16x4xf32>
    %117 = tpu.matmul %108, %116, %cst_64 {dimension_numbers = #tpu.dot_dimension_numbers<[2], [0], [0, 1], [1], [0, 0, 0, 1, 1, 1], [], []>} : vector<16x16x12xbf16>, vector<12x4xbf16>, vector<16x16x4xf32> -> vector<16x16x4xf32>
    "tpu.trace_stop"() : () -> ()
    %118 = arith.addf %114, %117 : vector<16x16x4xf32>
    %cst_65 = arith.constant 0.000000e+00 : bf16
    %119 = vector.broadcast %cst_65 : bf16 to vector<16x1x12xbf16>
    %120 = vector.extract_strided_slice %108 {offsets = [0, 1, 0], sizes = [16, 15, 12], strides = [1, 1, 1]} : vector<16x16x12xbf16> to vector<16x15x12xbf16>
    %121 = tpu.concatenate %120, %119 in 1 : vector<16x15x12xbf16>, vector<16x1x12xbf16> -> vector<16x16x12xbf16>
    %c2_66 = arith.constant 2 : index
    %c0_67 = arith.constant 0 : index
    %c0_68 = arith.constant 0 : index
    %122 = vector.load %arg3[%c2_66, %c0_67, %c0_68] : memref<3x12x4xbf16, #tpu.memory_space<vmem>>, vector<1x12x4xbf16>
    %123 = vector.shape_cast %122 : vector<1x12x4xbf16> to vector<12x4xbf16>
    "tpu.trace_start"() <{level = 10 : i32, message = "hwk,ko->hwo"}> : () -> ()
    %cst_69 = arith.constant dense<0.000000e+00> : vector<16x16x4xf32>
    %124 = tpu.matmul %121, %123, %cst_69 {dimension_numbers = #tpu.dot_dimension_numbers<[2], [0], [0, 1], [1], [0, 0, 0, 1, 1, 1], [], []>} : vector<16x16x12xbf16>, vector<12x4xbf16>, vector<16x16x4xf32> -> vector<16x16x4xf32>
    "tpu.trace_stop"() : () -> ()
    %125 = arith.addf %118, %124 : vector<16x16x4xf32>
    %126 = arith.index_cast %67 : i32 to index
    %c0_70 = arith.constant 0 : index
    %c0_71 = arith.constant 0 : index
    %127 = vector.load %arg6[%126, %c0_70, %c0_71] : memref<16x16x4xf32, #tpu.memory_space<vmem>>, vector<16x16x4xf32>
    tpu.vector_store %arg6[%126, %c0_70, %c0_71], %125 {strides = array<i32>} : memref<16x16x4xf32, #tpu.memory_space<vmem>>, vector<16x16x4xf32>,
    %cst_72 = arith.constant dense<0.000000e+00> : vector<4xf32>
    %128 = vector.multi_reduction <add>, %125, %cst_72 [0, 1] : vector<16x16x4xf32> to vector<4xf32>
    %129 = vector.shape_cast %128 : vector<4xf32> to vector<1x1x4xf32>
    %130 = arith.addf %0, %129 : vector<1x1x4xf32>
    %131 = arith.mulf %125, %125 : vector<16x16x4xf32>
    %cst_73 = arith.constant dense<0.000000e+00> : vector<4xf32>
    %132 = vector.multi_reduction <add>, %131, %cst_73 [0, 1] : vector<16x16x4xf32> to vector<4xf32>
    %133 = vector.shape_cast %132 : vector<4xf32> to vector<1x1x4xf32>
    %134 = arith.addf %0, %133 : vector<1x1x4xf32>
    %c1_i32_74 = arith.constant 1 : i32
    %cst_75 = arith.constant 3.906250e-03 : f32
    %135 = vector.broadcast %cst_75 : f32 to vector<1x1x4xf32>
    %136 = arith.mulf %130, %135 : vector<1x1x4xf32>
    %cst_76 = arith.constant 3.906250e-03 : f32
    %137 = vector.broadcast %cst_76 : f32 to vector<1x1x4xf32>
    %138 = arith.mulf %134, %137 : vector<1x1x4xf32>
    %139 = arith.mulf %136, %136 : vector<1x1x4xf32>
    %140 = arith.subf %138, %139 : vector<1x1x4xf32>
    %cst_77 = arith.constant 0.000000e+00 : f32
    %141 = vector.broadcast %cst_77 : f32 to vector<1x1x4xf32>
    %142 = arith.maximumf %140, %141 : vector<1x1x4xf32>
    %cst_78 = arith.constant 9.99999974E-6 : f32
    %143 = vector.broadcast %cst_78 : f32 to vector<1x1x4xf32>
    %144 = arith.addf %142, %143 : vector<1x1x4xf32>
    %145 = math.rsqrt %144 : vector<1x1x4xf32>
    %c0_i32_79 = arith.constant 0 : i32
    %c1_i32_80 = arith.constant 1 : i32
    %146 = arith.muli %c0_i32_79, %c1_i32_80 : i32
    %c0_i32_81 = arith.constant 0 : i32
    %147 = arith.addi %c0_i32_81, %146 : i32
    %c16_i32_82 = arith.constant 16 : i32
    %148 = arith.muli %147, %c16_i32_82 : i32
    %149 = tpu.assume_multiple %148, 16 : i32
    %150 = arith.index_cast %149 : i32 to index
    %c0_83 = arith.constant 0 : index
    %c0_84 = arith.constant 0 : index
    %151 = vector.load %arg6[%150, %c0_83, %c0_84] : memref<16x16x4xf32, #tpu.memory_space<vmem>>, vector<16x16x4xf32>
    %152 = vector.broadcast %136 : vector<1x1x4xf32> to vector<16x16x4xf32>
    %153 = arith.subf %151, %152 : vector<16x16x4xf32>
    %154 = vector.broadcast %145 : vector<1x1x4xf32> to vector<16x16x4xf32>
    %155 = arith.mulf %153, %154 : vector<16x16x4xf32>
    %cst_85 = arith.constant 0.000000e+00 : f32
    %156 = vector.broadcast %cst_85 : f32 to vector<16x16x4xf32>
    %157 = arith.maximumf %155, %156 : vector<16x16x4xf32>
    %c0_86 = arith.constant 0 : index
    %158 = arith.index_cast %149 : i32 to index
    %c0_87 = arith.constant 0 : index
    %c0_88 = arith.constant 0 : index
    %159 = vector.load %arg1[%c0_86, %158, %c0_87, %c0_88] : memref<1x16x16x4xf32, #tpu.memory_space<vmem>>, vector<1x16x16x4xf32>
    %160 = vector.shape_cast %159 : vector<1x16x16x4xf32> to vector<16x16x4xf32>
    %161 = arith.addf %157, %160 : vector<16x16x4xf32>
    %c0_89 = arith.constant 0 : index
    %162 = arith.index_cast %149 : i32 to index
    %c0_90 = arith.constant 0 : index
    %c0_91 = arith.constant 0 : index
    %163 = vector.load %arg4[%c0_89, %162, %c0_90, %c0_91] : memref<1x16x16x4xf32, #tpu.memory_space<vmem>>, vector<1x16x16x4xf32>
    %164 = vector.shape_cast %163 : vector<1x16x16x4xf32> to vector<16x16x4xf32>
    %165 = vector.shape_cast %161 : vector<16x16x4xf32> to vector<1x16x16x4xf32>
    tpu.vector_store %arg4[%c0_89, %162, %c0_90, %c0_91], %165 {strides = array<i32>} : memref<1x16x16x4xf32, #tpu.memory_space<vmem>>, vector<1x16x16x4xf32>,
    %c1_i32_92 = arith.constant 1 : i32
    return
  }
  func.func @transform_0(%arg0: i32) -> (i32, i32, i32, i32) {
    %c0_i32 = arith.constant 0 : i32
    %c0_i32_0 = arith.constant 0 : i32
    %c0_i32_1 = arith.constant 0 : i32
    %c0_i32_2 = arith.constant 0 : i32
    return %arg0, %c0_i32, %c0_i32_0, %c0_i32_1 : i32, i32, i32, i32
  }
  func.func @transform_1(%arg0: i32) -> (i32, i32, i32) {
    %c0_i32 = arith.constant 0 : i32
    %c0_i32_0 = arith.constant 0 : i32
    %c0_i32_1 = arith.constant 0 : i32
    %c0_i32_2 = arith.constant 0 : i32
    return %c0_i32, %c0_i32_0, %c0_i32_1 : i32, i32, i32
  }
  func.func @transform_2(%arg0: i32) -> (i32, i32, i32) {
    %c0_i32 = arith.constant 0 : i32
    %c0_i32_0 = arith.constant 0 : i32
    %c0_i32_1 = arith.constant 0 : i32
    %c0_i32_2 = arith.constant 0 : i32
    return %c0_i32, %c0_i32_0, %c0_i32_1 : i32, i32, i32
  }
  func.func @transform_3(%arg0: i32) -> (i32, i32, i32, i32) {
    %c0_i32 = arith.constant 0 : i32
    %c0_i32_0 = arith.constant 0 : i32
    %c0_i32_1 = arith.constant 0 : i32
    %c0_i32_2 = arith.constant 0 : i32
    return %arg0, %c0_i32, %c0_i32_0, %c0_i32_1 : i32, i32, i32, i32
  }
}

</mosaic_0001>

<bundles_post_ra>
// kernel: tpu_custom_call.1
= control target key start
LH: loop header
LB: loop body
LE: loop exit
PB: predicated region body
PF: predicated region fallthrough
CT: control target
= control target key end

     0   :  { %s3813_s12 = smov 0   ;;  %s5584_s0 = inlined_call_operand.vmem [shape: f32[2,16,16,4], index: 0, kind: input, shape index: {}]   ;;  %s5585_s1 = inlined_call_operand.vmem [shape: bf16[3,12,4], index: 1, kind: input, shape index: {}]   ;;  %s5586_s2 = inlined_call_operand.vmem [shape: bf16[3,12,4], index: 2, kind: input, shape index: {}]   ;;  %s5587_s3 = inlined_call_operand.vmem [shape: f32[2,16,16,4], index: 3, kind: output, shape index: {}]  }
   0x1 LB: > { %s3196_s13 = sadd.s32 4294967295, %s3788_s12   ;;  %p3200_p0 = scmp.ge.s32.totalorder %s3788_s12, 1  ;;  %s3788_s12 = sphi %s3813_s12, %s13_s12  }
   0x2   : > { %p137_p1 = scmp.lt.s32.totalorder %s3788_s12, 3 }
   0x4   : > { %p138_p2 = pnand %p3200_p0, %p137_p1 }
   0x6   : > { %141 = sbr.rel (%p138_p2) target bundleno = 1178 (0x49a), region = 32 }
   0xd   : > { %p161_p3 = scmp.lt.s32.totalorder %s3196_s13, 1  ;;  %v3772_v0 = vld [vmem:[%s5585_s1 + $0x8] sm:$0x3f]   ;;  %vm587_vm0 = vcmask 1045504   ;;  %v3831_v2 = vld [vmem:[%s5585_s1] sm:$0x3f]  }
   0xe   : > { %3755 = vmatprep.subr.msk.bf16.mxu0 %vm587_vm0, %v3772_v0  ;;  %v589_v1 = vsel %vm587_vm0, %v3772_v0, 0  ;;  %s3790_s22 = smov 8   ;;  %s3791_s23 = smov 4   ;;  %v5588_v51 = vmov 0.0|0.0   ;;  %vm331_vm1 = vcmask 31744   ;;  %vm380_vm2 = vcmask 64512  }
   0xf   : > { %s5628_s13 = smov (!%p161_p3, %s3196_s13), 1  ;;  %3424 = vmatpush3.bf16.msra.mxu0 %v589_v1  ;;  %vm554_vm3 = vcmask 97280   ;;  %v806_v59 = vsel %vm587_vm0, %v3831_v2, 0  ;;  %v3980_v60 = vld [vmem:[%s5585_s1 + $0x10] sm:$0x3f]   ;;  %vm525_vm4 = vcmask 1040384  }
  0x10   : > { %s3319_s18 = sshll.u32 %s5628_s13, 8  ;;  %3756 = vmatprep.subr.msk.bf16.mxu0 %vm587_vm0, %v3831_v2  ;;  %vm526_vm5 = vsmask.f32 256  ;;  %vm1017_vm7 = vcmask 1047552   ;;  %vm1018_vm8 = vsmask.f32 7424 }
  0x11   : > { %s3839_s21 = scalar_lea.vmem %s5584_s0, %s3319_s18  ;;  %vm4088_vm6 = vmand %vm525_vm4, %vm526_vm5  ;;  %s5454_s7 = scalar_lea.vmem %s5587_s3, %s3319_s18 }
  0x12   : > { %v176_v3 = vld [vmem:[%s3839_s21 + $0x10] sm:$0xff]  ;;  %v177_v4 = vld [vmem:[%s3839_s21 + $0x18] sm:$0xff]  ;;  %v174_v5 = vld [vmem:[%s3839_s21] sm:$0xff] }
  0x13   : > { %v3846_v6 = vpack.c.bf16 %v177_v4, %v176_v3  ;;  %v175_v7 = vld [vmem:[%s3839_s21 + $0x8] sm:$0xff]  ;;  %v178_v8 = vld [vmem:[%s3839_s21 + $0x20] sm:$0xff]  ;;  %v180_v12 = vld [vmem:[%s3839_s21 + $0x30] sm:$0xff] }
  0x14   : > { %v179_v9 = vld [vmem:[%s3839_s21 + $0x28] sm:$0xff]  ;;  %v3851_v10 = vpack.c.bf16 %v175_v7, %v174_v5  ;;  %v181_v13 = vld [vmem:[%s3839_s21 + $0x38] sm:$0xff]  ;;  %v182_v15 = vld [vmem:[%s3839_s21 + $0x40] sm:$0xff] }
  0x15   : > { %299 = vrot.lane.b32.xlu1 %v3846_v6, %s3790_s22  ;;  %v3855_v11 = vpack.c.bf16 %v179_v9, %v178_v8  ;;  %v3863_v14 = vpack.c.bf16 %v181_v13, %v180_v12  ;;  %v183_v16 = vld [vmem:[%s3839_s21 + $0x48] sm:$0xff]  ;;  %v184_v17 = vld [vmem:[%s3839_s21 + $0x50] sm:$0xff]  ;;  %v185_v19 = vld [vmem:[%s3839_s21 + $0x58] sm:$0xff] }
  0x16   : > { %266 = vrot.lane.b32.xlu0 %v3851_v10, %s3791_s23  ;;  %v3872_v18 = vpack.c.bf16 %v183_v16, %v182_v15  ;;  %v3879_v20 = vpack.c.bf16 %v185_v19, %v184_v17  ;;  %v186_v21 = vld [vmem:[%s3839_s21 + $0x60] sm:$0xff]  ;;  %v187_v22 = vld [vmem:[%s3839_s21 + $0x68] sm:$0xff]  ;;  %v188_v24 = vld [vmem:[%s3839_s21 + $0x70] sm:$0xff] }
  0x17   : > { %v3887_v23 = vpack.c.bf16 %v187_v22, %v186_v21  ;;  %v189_v25 = vld [vmem:[%s3839_s21 + $0x78] sm:$0xff]  ;;  %v190_v27 = vld [vmem:[%s3839_s21 + $0x80] sm:$0xff]  ;;  %v191_v28 = vld [vmem:[%s3839_s21 + $0x88] sm:$0xff] }
  0x18   : > { %v3895_v26 = vpack.c.bf16 %v189_v25, %v188_v24  ;;  %v3903_v29 = vpack.c.bf16 %v191_v28, %v190_v27  ;;  %v192_v30 = vld [vmem:[%s3839_s21 + $0x90] sm:$0xff]  ;;  %v193_v31 = vld [vmem:[%s3839_s21 + $0x98] sm:$0xff]  ;;  %v194_v33 = vld [vmem:[%s3839_s21 + $0xa0] sm:$0xff] }
  0x19   : > { %301 = vrot.lane.b32.xlu1 %v3855_v11, %s3790_s22  ;;  %v3911_v32 = vpack.c.bf16 %v193_v31, %v192_v30  ;;  %v195_v34 = vld [vmem:[%s3839_s21 + $0xa8] sm:$0xff]  ;;  %v196_v36 = vld [vmem:[%s3839_s21 + $0xb0] sm:$0xff]  ;;  %v197_v37 = vld [vmem:[%s3839_s21 + $0xb8] sm:$0xff] }
  0x1a   : > { %268 = vrot.lane.b32.xlu0 %v3846_v6, %s3791_s23  ;;  %v3919_v35 = vpack.c.bf16 %v195_v34, %v194_v33  ;;  %v3927_v38 = vpack.c.bf16 %v197_v37, %v196_v36  ;;  %v198_v39 = vld [vmem:[%s3839_s21 + $0xc0] sm:$0xff]  ;;  %v199_v40 = vld [vmem:[%s3839_s21 + $0xc8] sm:$0xff]  ;;  %v200_v42 = vld [vmem:[%s3839_s21 + $0xd0] sm:$0xff] }
  0x1b   : > { %v3935_v41 = vpack.c.bf16 %v199_v40, %v198_v39  ;;  %v201_v43 = vld [vmem:[%s3839_s21 + $0xd8] sm:$0xff]  ;;  %v202_v45 = vld [vmem:[%s3839_s21 + $0xe0] sm:$0xff]  ;;  %v203_v46 = vld [vmem:[%s3839_s21 + $0xe8] sm:$0xff] }
  0x1c   : > { %v3943_v44 = vpack.c.bf16 %v201_v43, %v200_v42  ;;  %v3951_v47 = vpack.c.bf16 %v203_v46, %v202_v45  ;;  %v204_v48 = vld [vmem:[%s3839_s21 + $0xf0] sm:$0xff]  ;;  %v205_v49 = vld [vmem:[%s3839_s21 + $0xf8] sm:$0xff]  ;;  %vm4238_vm9 = vmand %vm1017_vm7, %vm1018_vm8 }
  0x1d   : > { %272 = vrot.lane.b32.xlu1 %v3863_v14, %s3791_s23  ;;  %v248_v50 = vpack.c.bf16 %v205_v49, %v204_v48 }
  0x1e   : > { %270 = vrot.lane.b32.xlu0 %v3855_v11, %s3791_s23 }
  0x21   : > { %305 = vrot.lane.b32.xlu1 %v3872_v18, %s3790_s22 }
  0x22   : > { %303 = vrot.lane.b32.xlu0 %v3863_v14, %s3790_s22 }
  0x25   : > { %276 = vrot.lane.b32.xlu1 %v3879_v20, %s3791_s23 }
  0x26   : > { %274 = vrot.lane.b32.xlu0 %v3872_v18, %s3791_s23 }
  0x29   : > { %309 = vrot.lane.b32.xlu1 %v3887_v23, %s3790_s22 }
  0x2a   : > { %307 = vrot.lane.b32.xlu0 %v3879_v20, %s3790_s22 }
  0x2d   : > { %280 = vrot.lane.b32.xlu1 %v3895_v26, %s3791_s23 }
  0x2e   : > { %278 = vrot.lane.b32.xlu0 %v3887_v23, %s3791_s23 }
  0x31   : > { %313 = vrot.lane.b32.xlu1 %v3903_v29, %s3790_s22 }
  0x32   : > { %311 = vrot.lane.b32.xlu0 %v3895_v26, %s3790_s22 }
  0x35   : > { %284 = vrot.lane.b32.xlu1 %v3911_v32, %s3791_s23 }
  0x36   : > { %282 = vrot.lane.b32.xlu0 %v3903_v29, %s3791_s23 }
  0x39   : > { %317 = vrot.lane.b32.xlu1 %v3919_v35, %s3790_s22 }
  0x3a   : > { %315 = vrot.lane.b32.xlu0 %v3911_v32, %s3790_s22 }
  0x3d   : > { %288 = vrot.lane.b32.xlu1 %v3927_v38, %s3791_s23 }
  0x3e   : > { %286 = vrot.lane.b32.xlu0 %v3919_v35, %s3791_s23 }
  0x41   : > { %321 = vrot.lane.b32.xlu1 %v3935_v41, %s3790_s22 }
  0x42   : > { %319 = vrot.lane.b32.xlu0 %v3927_v38, %s3790_s22 }
  0x45   : > { %292 = vrot.lane.b32.xlu1 %v3943_v44, %s3791_s23 }
  0x46   : > { %290 = vrot.lane.b32.xlu0 %v3935_v41, %s3791_s23 }
  0x49   : > { %325 = vrot.lane.b32.xlu1 %v3951_v47, %s3790_s22 }
  0x4a   : > { %323 = vrot.lane.b32.xlu0 %v3943_v44, %s3790_s22 }
  0x4d   : > { %296 = vrot.lane.b32.xlu1 %v248_v50, %s3791_s23 }
  0x4e   : > { %294 = vrot.lane.b32.xlu0 %v3951_v47, %s3791_s23 }
  0x51   : > { %329 = vrot.lane.b32.xlu1 %v5588_v51, %s3790_s22 }
  0x52   : > { %327 = vrot.lane.b32.xlu0 %v248_v50, %s3790_s22 }
  0x87   : > { %v300_v52 = vpop.permute.xlu1 %299 }
  0x88   : > { %v267_v53 = vpop.permute.xlu0 %266 }
  0x89   : > { %v334_v54 = vsel %vm331_vm1, 0.0|0.0, %v267_v53 }
  0x8a   : > { %v3969_v55 = vsel %vm380_vm2, %v334_v54, %v300_v52 }
  0x8b   : > { %3425 = vmatprep.mubr.msk.bf16.mxu0 %vm554_vm3, %v3969_v55  ;;  %v302_v56 = vpop.permute.xlu1 %301 }
  0x8c   : > { %v269_v57 = vpop.permute.xlu0 %268 }
  0x8d   : > { %v337_v58 = vsel %vm331_vm1, %v3851_v10, %v269_v57 }
  0x8e   : > { %v3983_v61 = vsel %vm380_vm2, %v337_v58, %v302_v56 }
  0x8f   : > { %3426 = vmatmul.mubr.msk.bf16.vlgmr.msra.gmra.mrb[0].mxu0 %vm554_vm3, %v3983_v61  ;;  %v273_v62 = vpop.permute.xlu1 %272  ;;  %v419_v54 = vshrl.u32 %v3983_v61, 16 }
  0x90   : > { %3458 = vmatpush3.bf16.msra.mxu0 %v806_v59  ;;  %v271_v63 = vpop.permute.xlu0 %270  ;;  %v343_v0 = vsel %vm331_vm1, %v3855_v11, %v273_v62 }
  0x91   : > { %3757 = vmatprep.subr.msk.bf16.mxu0 %vm587_vm0, %v3980_v60  ;;  %v340_v2 = vsel %vm331_vm1, %v3846_v6, %v271_v63 }
  0x93   : > { %v306_v1 = vpop.permute.xlu1 %305 }
  0x94   : > { %v3994_v3 = vsel %vm380_vm2, %v343_v0, %v306_v1  ;;  %v304_v4 = vpop.permute.xlu0 %303 }
  0x95   : > { %v3997_v5 = vsel %vm380_vm2, %v340_v2, %v304_v4 }
  0x96   : > { %3429 = vmatprep.mubr.msk.bf16.mxu0 %vm554_vm3, %v3997_v5  ;;  %v425_v56 = vshrl.u32 %v3997_v5, 16 }
  0x97   : > { %3430 = vmatmul.mubr.msk.bf16.gmra.mrb[4].mxu0 %vm554_vm3, %v3994_v3  ;;  %v277_v7 = vpop.permute.xlu1 %276 }
  0x98   : > { %v275_v8 = vpop.permute.xlu0 %274  ;;  %v349_v9 = vsel %vm331_vm1, %v3872_v18, %v277_v7  ;;  %v422_v7 = vshll.u32 %v3983_v61, 16 }
  0x99   : > { %v346_v6 = vsel %vm331_vm1, %v3863_v14, %v275_v8  ;;  %v428_v8 = vshll.u32 %v3997_v5, 16 }
  0x9b   : > { %v310_v10 = vpop.permute.xlu1 %309 }
  0x9c   : > { %v4008_v11 = vsel %vm380_vm2, %v349_v9, %v310_v10  ;;  %v308_v12 = vpop.permute.xlu0 %307  ;;  %v431_v10 = vshrl.u32 %v3994_v3, 16 }
  0x9d   : > { %v4011_v13 = vsel %vm380_vm2, %v346_v6, %v308_v12 }
  0x9e   : > { %3433 = vmatprep.mubr.msk.bf16.mxu0 %vm554_vm3, %v4011_v13  ;;  %v437_v6 = vshrl.u32 %v4011_v13, 16 }
  0x9f   : > { %3434 = vmatmul.mubr.msk.bf16.gmra.mrb[8].mxu0 %vm554_vm3, %v4008_v11  ;;  %v281_v15 = vpop.permute.xlu1 %280 }
  0xa0   : > { %v279_v16 = vpop.permute.xlu0 %278  ;;  %v355_v17 = vsel %vm331_vm1, %v3887_v23, %v281_v15  ;;  %v1093_v15 = vsel %vm587_vm0, %v3980_v60, 0  ;;  %v440_v60 = vshll.u32 %v4011_v13, 16 }
  0xa1   : > { %v352_v14 = vsel %vm331_vm1, %v3879_v20, %v279_v16  ;;  %v433_v16 = vrot.slane %v431_v10, 7 }
  0xa3   : > { %v314_v18 = vpop.permute.xlu1 %313 }
  0xa4   : > { %v4022_v19 = vsel %vm380_vm2, %v355_v17, %v314_v18  ;;  %v312_v21 = vpop.permute.xlu0 %311  ;;  %v439_v18 = vrot.slane %v437_v6, 7 }
  0xa5   : > { %v4025_v22 = vsel %vm380_vm2, %v352_v14, %v312_v21  ;;  %v434_v21 = vshll.u32 %v3994_v3, 16 }
  0xa6   : > { %3437 = vmatprep.mubr.msk.bf16.mxu0 %vm554_vm3, %v4025_v22 }
  0xa7   : > { %3438 = vmatmul.mubr.msk.bf16.gmra.mrb[12].mxu0 %vm554_vm3, %v4022_v19  ;;  %v285_v24 = vpop.permute.xlu1 %284 }
  0xa8   : > { %v283_v25 = vpop.permute.xlu0 %282  ;;  %v361_v23 = vsel %vm331_vm1, %v3903_v29, %v285_v24  ;;  %v443_v24 = vshrl.u32 %v4008_v11, 16 }
  0xa9   : > { %v358_v20 = vsel %vm331_vm1, %v3895_v26, %v283_v25  ;;  %v436_v25 = vor.u32 %v434_v21, %v433_v16 }
  0xab   : > { %v318_v27 = vpop.permute.xlu1 %317 }
  0xac   : > { %v4036_v28 = vsel %vm380_vm2, %v361_v23, %v318_v27  ;;  %v316_v30 = vpop.permute.xlu0 %315  ;;  %v449_v23 = vshrl.u32 %v4025_v22, 16  ;;  %v442_v27 = vor.u32 %v440_v60, %v439_v18 }
  0xad   : > { %v4039_v31 = vsel %vm380_vm2, %v358_v20, %v316_v30  ;;  %v445_v20 = vrot.slane %v443_v24, 7  ;;  %v531_v30 = vsel %vm4088_vm6, 0, %v436_v25 }
  0xae   : > { %3441 = vmatprep.mubr.msk.bf16.mxu0 %vm554_vm3, %v4039_v31 }
  0xaf   : > { %3442 = vmatmul.mubr.msk.bf16.gmra.mrb[16].mxu0 %vm554_vm3, %v4036_v28  ;;  %v289_v33 = vpop.permute.xlu1 %288 }
  0xb0   : > { %v287_v34 = vpop.permute.xlu0 %286  ;;  %v367_v29 = vsel %vm331_vm1, %v3919_v35, %v289_v33  ;;  %v413_v35 = vshrl.u32 %v3969_v55, 16  ;;  %v451_v33 = vrot.slane %v449_v23, 7 }
  0xb1   : > { %v364_v26 = vsel %vm331_vm1, %v3911_v32, %v287_v34  ;;  %v532_v34 = vsel %vm4088_vm6, 0, %v442_v27 }
  0xb2   : > { %v415_v52 = vrot.slane %v413_v35, 7 }
  0xb3   : > { %v322_v36 = vpop.permute.xlu1 %321 }
  0xb4   : > { %v4050_v37 = vsel %vm380_vm2, %v367_v29, %v322_v36  ;;  %v320_v39 = vpop.permute.xlu0 %319  ;;  %v446_v29 = vshll.u32 %v4008_v11, 16  ;;  %v452_v36 = vshll.u32 %v4025_v22, 16 }
  0xb5   : > { %v4053_v40 = vsel %vm380_vm2, %v364_v26, %v320_v39  ;;  %v455_v26 = vshrl.u32 %v4022_v19, 16 }
  0xb6   : > { %3445 = vmatprep.mubr.msk.bf16.mxu0 %vm554_vm3, %v4053_v40  ;;  %v448_v39 = vor.u32 %v446_v29, %v445_v20  ;;  %v482_v20 = vshll.u32 %v4050_v37, 16 }
  0xb7   : > { %3446 = vmatmul.mubr.msk.bf16.gmra.mrb[20].mxu0 %vm554_vm3, %v4050_v37  ;;  %v293_v42 = vpop.permute.xlu1 %292 }
  0xb8   : > { %v291_v43 = vpop.permute.xlu0 %290  ;;  %v373_v32 = vsel %vm331_vm1, %v3935_v41, %v293_v42  ;;  %v461_v42 = vshrl.u32 %v4039_v31, 16 }
  0xb9   : > { %v370_v46 = vsel %vm331_vm1, %v3927_v38, %v291_v43  ;;  %v416_v38 = vshll.u32 %v3969_v55, 16  ;;  %v454_v43 = vor.u32 %v452_v36, %v451_v33 }
  0xbb   : > { %v326_v45 = vpop.permute.xlu1 %325  ;;  %v418_v59 = vor.u32 %v416_v38, %v415_v52  ;;  %v458_v52 = vshll.u32 %v4022_v19, 16 }
  0xbc   : > { %v4065_v48 = vsel %vm380_vm2, %v373_v32, %v326_v45  ;;  %v324_v49 = vpop.permute.xlu0 %323  ;;  %v457_v32 = vrot.slane %v455_v26, 7  ;;  %v533_v45 = vsel %vm4088_vm6, 0, %v448_v39 }
  0xbd   : > { %v4068_v50 = vsel %vm380_vm2, %v370_v46, %v324_v49  ;;  %v528_v4 = vsel %vm4088_vm6, 0, %v418_v59  ;;  %v463_v46 = vrot.slane %v461_v42, 7  ;;  %v534_v49 = vsel %vm4088_vm6, 0, %v454_v43 }
  0xbe   : > { %3449 = vmatprep.mubr.msk.bf16.mxu0 %vm554_vm3, %v4068_v50  ;;  %v485_v16 = vshrl.u32 %v4068_v50, 16  ;;  %v491_v33 = vshrl.u32 %v4065_v48, 16 }
  0xbf   : > { %3450 = vmatmul.mubr.msk.bf16.gmra.mrb[24].mxu0 %vm554_vm3, %v4065_v48  ;;  %v297_v41 = vpop.permute.xlu1 %296 }
  0xc0   : > { %v295_v53 = vpop.permute.xlu0 %294  ;;  %v379_v57 = vsel %vm331_vm1, %v3951_v47, %v297_v41  ;;  %v421_v47 = vrot.slane %v419_v54, 7  ;;  %v464_v41 = vshll.u32 %v4039_v31, 16  ;;  %v487_v25 = vrot.slane %v485_v16, 7 }
  0xc1   : > { %v376_v62 = vsel %vm331_vm1, %v3943_v44, %v295_v53  ;;  %v427_v44 = vrot.slane %v425_v56, 7  ;;  %v467_v53 = vshrl.u32 %v4036_v28, 16 }
  0xc2   : > { %v424_v9 = vor.u32 %v422_v7, %v421_v47  ;;  %v466_v59 = vor.u32 %v464_v41, %v463_v46 }
  0xc3   : > { %v330_v58 = vpop.permute.xlu1 %329  ;;  %v430_v12 = vor.u32 %v428_v8, %v427_v44 }
  0xc4   : > { %v4086_v63 = vsel %vm380_vm2, %v379_v57, %v330_v58  ;;  %v328_v0 = vpop.permute.xlu0 %327  ;;  %v529_v17 = vsel %vm4088_vm6, 0, %v424_v9  ;;  %v460_v57 = vor.u32 %v458_v52, %v457_v32  ;;  %v473_v58 = vshrl.u32 %v4053_v40, 16 }
  0xc5   : > { %v4093_v2 = vsel %vm380_vm2, %v376_v62, %v328_v0  ;;  %v530_v14 = vsel %vm4088_vm6, 0, %v430_v12  ;;  %v469_v62 = vrot.slane %v467_v53, 7  ;;  %v536_v44 = vsel %vm4088_vm6, 0, %v466_v59 }
  0xc6   : > { %3453 = vmatprep.mubr.msk.bf16.mxu0 %vm554_vm3, %v4093_v2  ;;  %v535_v0 = vsel %vm4088_vm6, 0, %v460_v57  ;;  %v475_v47 = vrot.slane %v473_v58, 7  ;;  %v476_v9 = vshll.u32 %v4053_v40, 16  ;;  %v479_v12 = vshrl.u32 %v4050_v37, 16 }
  0xc7   : > { %3454 = vmatmul.mubr.msk.bf16.gmra.mrb[28].mxu0 %vm554_vm3, %v4086_v63  ;;  %v497_v39 = vshrl.u32 %v4093_v2, 16  ;;  %v493_v32 = vrot.slane %v491_v33, 7  ;;  %v494_v57 = vshll.u32 %v4065_v48, 16  ;;  %v500_v59 = vshll.u32 %v4093_v2, 16 }
  0xc8   : > { %3459 = vmatprep.mubr.msk.bf16.mxu0 %vm554_vm3, %v528_v4  ;;  %v470_v4 = vshll.u32 %v4036_v28, 16  ;;  %v481_v18 = vrot.slane %v479_v12, 7 }
  0xc9   : > { %v499_v46 = vrot.slane %v497_v39, 7 }
  0xcf   : > { %3460 = vmatmul.mubr.msk.bf16.vlgmr.msra.gmra.mrb[0].mxu0 %vm554_vm3, %v529_v17  ;;  %v478_v17 = vor.u32 %v476_v9, %v475_v47  ;;  %v502_v47 = vor.u32 %v500_v59, %v499_v46 }
  0xd0   : > { %3492 = vmatpush3.bf16.msra.mxu0 %v1093_v15  ;;  %3463 = vmatprep.mubr.msk.bf16.mxu0 %vm554_vm3, %v530_v14  ;;  %v472_v15 = vor.u32 %v470_v4, %v469_v62  ;;  %v503_v62 = vshrl.u32 %v4086_v63, 16 }
  0xd1   : > { %v538_v27 = vsel %vm4088_vm6, 0, %v478_v17  ;;  %v969_v17 = vrot.slane %v416_v38, 1  ;;  %v971_v38 = vrot.slane %v422_v7, 1  ;;  %v975_v7 = vrot.slane %v434_v21, 1 }
  0xd2   : > { %v537_v14 = vsel %vm4088_vm6, 0, %v472_v15  ;;  %v981_v21 = vrot.slane %v452_v36, 1 }
  0xd3   : > { %v972_v55 = vor.u32 %v971_v38, %v419_v54  ;;  %v976_v61 = vor.u32 %v975_v7, %v431_v10  ;;  %v979_v54 = vrot.slane %v446_v29, 1  ;;  %v983_v10 = vrot.slane %v458_v52, 1 }
  0xd4   : > { %v982_v13 = vor.u32 %v981_v21, %v449_v23  ;;  %v985_v29 = vrot.slane %v464_v41, 1  ;;  %v989_v52 = vrot.slane %v476_v9, 1 }
  0xd5   : > { %v1021_v46 = vsel %vm4238_vm9, %v972_v55, 0  ;;  %v980_v3 = vor.u32 %v979_v54, %v443_v24  ;;  %v984_v11 = vor.u32 %v983_v10, %v455_v26  ;;  %v987_v24 = vrot.slane %v470_v4, 1 }
  0xd6   : > { %v1026_v36 = vsel %vm4238_vm9, %v982_v13, 0  ;;  %v986_v22 = vor.u32 %v985_v29, %v461_v42  ;;  %v990_v31 = vor.u32 %v989_v52, %v473_v58  ;;  %v991_v26 = vrot.slane %v482_v20, 1 }
  0xd7   : > { %3464 = vmatmul.mubr.msk.bf16.gmra.mrb[4].mxu0 %vm554_vm3, %v531_v30  ;;  %v488_v30 = vshll.u32 %v4068_v50, 16  ;;  %v1027_v23 = vsel %vm4238_vm9, %v984_v11, 0  ;;  %v988_v19 = vor.u32 %v987_v24, %v467_v53  ;;  %v995_v53 = vrot.slane %v494_v57, 1 }
  0xd8   : > { %3467 = vmatprep.mubr.msk.bf16.mxu0 %vm554_vm3, %v532_v34  ;;  %v484_v34 = vor.u32 %v482_v20, %v481_v18  ;;  %v542_v18 = vsel %vm4088_vm6, 0, %v502_v47  ;;  %v1028_v41 = vsel %vm4238_vm9, %v986_v22, 0  ;;  %v1030_v9 = vsel %vm4238_vm9, %v990_v31, 0 }
  0xd9   : > { %v490_v43 = vor.u32 %v488_v30, %v487_v25  ;;  %v1029_v42 = vsel %vm4238_vm9, %v988_v19, 0  ;;  %v993_v4 = vrot.slane %v488_v30, 1  ;;  %v992_v28 = vor.u32 %v991_v26, %v479_v12 }
  0xda   : > { %v997_v20 = vrot.slane %v500_v59, 1  ;;  %v996_v37 = vor.u32 %v995_v53, %v491_v33 }
  0xdb   : > { %v994_v40 = vor.u32 %v993_v4, %v485_v16  ;;  %v1031_v58 = vsel %vm4238_vm9, %v992_v28, 0 }
  0xdc   : > { %v998_v50 = vor.u32 %v997_v20, %v497_v39  ;;  %v1033_v16 = vsel %vm4238_vm9, %v996_v37, 0 }
  0xdd   : > { %v1032_v30 = vsel %vm4238_vm9, %v994_v40, 0 }
  0xdf   : > { %3468 = vmatmul.mubr.msk.bf16.gmra.mrb[8].mxu0 %vm554_vm3, %v533_v45  ;;  %v539_v45 = vsel %vm4088_vm6, 0, %v484_v34 }
  0xe0   : > { %3471 = vmatprep.mubr.msk.bf16.mxu0 %vm554_vm3, %v534_v49  ;;  %v540_v49 = vsel %vm4088_vm6, 0, %v490_v43 }
  0xe7   : > { %3472 = vmatmul.mubr.msk.bf16.gmra.mrb[12].mxu0 %vm554_vm3, %v535_v0  ;;  %v496_v0 = vor.u32 %v494_v57, %v493_v32  ;;  %v973_v32 = vrot.slane %v428_v8, 1  ;;  %v977_v8 = vrot.slane %v440_v60, 1  ;;  %v1034_v57 = vsel %vm4238_vm9, %v998_v50, 0 }
  0xe8   : > { %3475 = vmatprep.mubr.msk.bf16.mxu0 %vm554_vm3, %v536_v44  ;;  %v505_v44 = vrot.slane %v503_v62, 7 }
  0xe9   : > { %v541_v15 = vsel %vm4088_vm6, 0, %v496_v0  ;;  %v978_v5 = vor.u32 %v977_v8, %v437_v6  ;;  %v1025_v6 = vsel %vm4238_vm9, %v980_v3, 0 }
  0xeb   : > { %v1024_v60 = vsel %vm4238_vm9, %v978_v5, 0 }
  0xef   : > { %3476 = vmatmul.mubr.msk.bf16.gmra.mrb[16].mxu0 %vm554_vm3, %v537_v14  ;;  %v506_v14 = vshll.u32 %v4086_v63, 16 }
  0xf0   : > { %3479 = vmatprep.mubr.msk.bf16.mxu0 %vm554_vm3, %v538_v27  ;;  %v970_v27 = vor.u32 %v969_v17, %v413_v35  ;;  %v974_v35 = vor.u32 %v973_v32, %v425_v56  ;;  %v1023_v56 = vsel %vm4238_vm9, %v976_v61, 0 }
  0xf1   : > { %v508_v25 = vor.u32 %v506_v14, %v505_v44  ;;  %v999_v12 = vrot.slane %v506_v14, 1 }
  0xf3   : > { %v543_v43 = vsel %vm4088_vm6, 0, %v508_v25  ;;  %v1000_v48 = vor.u32 %v999_v12, %v503_v62 }
  0xf5   : > { %v1035_v2 = vsel %vm4238_vm9, %v1000_v48, 0 }
  0xf7   : > { %3480 = vmatmul.mubr.msk.bf16.gmra.mrb[20].mxu0 %vm554_vm3, %v539_v45  ;;  %v1020_v45 = vsel %vm4238_vm9, %v970_v27, 0 }
  0xf8   : > { %3483 = vmatprep.mubr.msk.bf16.mxu0 %vm554_vm3, %v540_v49  ;;  %v1022_v49 = vsel %vm4238_vm9, %v974_v35, 0 }
  0xff   : > { %3484 = vmatmul.mubr.msk.bf16.gmra.mrb[24].mxu0 %vm554_vm3, %v541_v15 }
 0x100   : > { %3487 = vmatprep.mubr.msk.bf16.mxu0 %vm554_vm3, %v542_v18 }
 0x107   : > { %3488 = vmatmul.mubr.msk.bf16.gmra.mrb[28].mxu0 %vm554_vm3, %v543_v43 }
 0x108   : > { %3493 = vmatprep.mubr.msk.bf16.mxu0 %vm554_vm3, %v1020_v45 }
 0x10f   : > { %3494 = vmatmul.mubr.msk.bf16.vlgmr.msra.gmra.mrb[0].mxu0 %vm554_vm3, %v1021_v46 }
 0x110   : > { %3497 = vmatprep.mubr.msk.bf16.mxu0 %vm554_vm3, %v1022_v49 }
 0x117   : > { %3498 = vmatmul.mubr.msk.bf16.gmra.mrb[4].mxu0 %vm554_vm3, %v1023_v56 }
 0x118   : > { %3501 = vmatprep.mubr.msk.bf16.mxu0 %vm554_vm3, %v1024_v60 }
 0x11f   : > { %3502 = vmatmul.mubr.msk.bf16.gmra.mrb[8].mxu0 %vm554_vm3, %v1025_v6 }
 0x120   : > { %3505 = vmatprep.mubr.msk.bf16.mxu0 %vm554_vm3, %v1026_v36 }
 0x127   : > { %3506 = vmatmul.mubr.msk.bf16.gmra.mrb[12].mxu0 %vm554_vm3, %v1027_v23 }
 0x128   : > { %3509 = vmatprep.mubr.msk.bf16.mxu0 %vm554_vm3, %v1028_v41 }
 0x12f   : > { %3510 = vmatmul.mubr.msk.bf16.gmra.mrb[16].mxu0 %vm554_vm3, %v1029_v42 }
 0x130   : > { %3513 = vmatprep.mubr.msk.bf16.mxu0 %vm554_vm3, %v1030_v9 }
 0x137   : > { %3514 = vmatmul.mubr.msk.bf16.gmra.mrb[20].mxu0 %vm554_vm3, %v1031_v58 }
 0x138   : > { %3517 = vmatprep.mubr.msk.bf16.mxu0 %vm554_vm3, %v1032_v30 }
 0x13f   : > { %3518 = vmatmul.mubr.msk.bf16.gmra.mrb[24].mxu0 %vm554_vm3, %v1033_v16 }
 0x140   : > { %3521 = vmatprep.mubr.msk.bf16.mxu0 %vm554_vm3, %v1034_v57 }
 0x147   : > { %3522 = vmatmul.mubr.msk.bf16.gmra.mrb[28].mxu0 %vm554_vm3, %v1035_v2 }
 0x1e2   : > { %v3495_v33 = vpop.f32.mrb[0].mxu0 }
 0x1e3   : > { %1291 = vst.msk [vmem:[#allocation2 + $0x10] sm:$0xff] %vm331_vm1, %v3495_v33  ;;  %v1129_v39 = vpop.f32.mrb[1].mxu0  ;;  %v1393_v44 = vmul.f32 %v3495_v33, %v3495_v33  ;;  %v1324_v18 = vsel %vm331_vm1, %v3495_v33, 0.0 }
 0x1e4   : > { %1289 = vst.msk [vmem:[#allocation2] sm:$0xff] %vm331_vm1, %v1129_v39  ;;  %v1391_v59 = vmul.f32 %v1129_v39, %v1129_v39  ;;  %v3496_v0 = vpop.f32.mrb[2].mxu0  ;;  %v1321_v63 = vsel %vm331_vm1, %v1129_v39, 0.0 }
 0x1e5   : > { %1292 = vst.msk [vmem:[#allocation2 + $0x18] sm:$0xff] %vm331_vm1, %v3496_v0  ;;  %v1132_v47 = vpop.f32.mrb[3].mxu0  ;;  %v1394_v25 = vmul.f32 %v3496_v0, %v3496_v0  ;;  %v1426_v32 = vsel %vm331_vm1, %v1393_v44, 0.0  ;;  %v1326_v45 = vsel %vm331_vm1, %v3496_v0, 0.0 }
 0x1e6   : > { %1290 = vst.msk [vmem:[#allocation2 + $0x8] sm:$0xff] %vm331_vm1, %v1132_v47  ;;  %v1322_v62 = vsel %vm331_vm1, %v1132_v47, 0.0  ;;  %v1392_v15 = vmul.f32 %v1132_v47, %v1132_v47  ;;  %v1423_v14 = vsel %vm331_vm1, %v1391_v59, 0.0 }
 0x1e7   : > { %v1323_v17 = vadd.f32 %v1322_v62, %v1321_v63  ;;  %v1428_v8 = vsel %vm331_vm1, %v1394_v25, 0.0 }
 0x1e8   : > { %v1424_v27 = vsel %vm331_vm1, %v1392_v15, 0.0 }
 0x1e9   : > { %v1325_v38 = vadd.f32 %v1324_v18, %v1323_v17  ;;  %v1425_v43 = vadd.f32 %v1424_v27, %v1423_v14 }
 0x1ea   : > { %v3499_v55 = vpop.f32.mrb[4].mxu0 }
 0x1eb   : > { %v1427_v35 = vadd.f32 %v1426_v32, %v1425_v43  ;;  %1295 = vst.msk [vmem:[#allocation2 + $0x30] sm:$0xff] %vm331_vm1, %v3499_v55  ;;  %v1145_v7 = vpop.f32.mrb[5].mxu0  ;;  %v1327_v46 = vadd.f32 %v1326_v45, %v1325_v38  ;;  %v1397_v60 = vmul.f32 %v3499_v55, %v3499_v55  ;;  %v1332_v36 = vsel %vm331_vm1, %v3499_v55, 0.0 }
 0x1ec   : > { %1293 = vst.msk [vmem:[#allocation2 + $0x20] sm:$0xff] %vm331_vm1, %v1145_v7  ;;  %v1328_v49 = vsel %vm331_vm1, %v1145_v7, 0.0  ;;  %v1395_v61 = vmul.f32 %v1145_v7, %v1145_v7  ;;  %v3500_v5 = vpop.f32.mrb[6].mxu0 }
 0x1ed   : > { %v1329_v54 = vadd.f32 %v1328_v49, %v1327_v46  ;;  %v1429_v56 = vadd.f32 %v1428_v8, %v1427_v35  ;;  %1296 = vst.msk [vmem:[#allocation2 + $0x38] sm:$0xff] %vm331_vm1, %v3500_v5  ;;  %v1148_v21 = vpop.f32.mrb[7].mxu0  ;;  %v1398_v11 = vmul.f32 %v3500_v5, %v3500_v5  ;;  %v1434_v52 = vsel %vm331_vm1, %v1397_v60, 0.0 }
 0x1ee   : > { %v1430_v3 = vsel %vm331_vm1, %v1395_v61, 0.0  ;;  %1294 = vst.msk [vmem:[#allocation2 + $0x28] sm:$0xff] %vm331_vm1, %v1148_v21  ;;  %v1330_v13 = vsel %vm331_vm1, %v1148_v21, 0.0  ;;  %v1396_v10 = vmul.f32 %v1148_v21, %v1148_v21  ;;  %v1334_v41 = vsel %vm331_vm1, %v3500_v5, 0.0 }
 0x1ef   : > { %v1431_v6 = vadd.f32 %v1430_v3, %v1429_v56  ;;  %v1331_v29 = vadd.f32 %v1330_v13, %v1329_v54  ;;  %v1436_v4 = vsel %vm331_vm1, %v1398_v11, 0.0 }
 0x1f0   : > { %v1432_v22 = vsel %vm331_vm1, %v1396_v10, 0.0 }
 0x1f1   : > { %v1333_v24 = vadd.f32 %v1332_v36, %v1331_v29  ;;  %v1433_v23 = vadd.f32 %v1432_v22, %v1431_v6 }
 0x1f2   : > { %v3503_v19 = vpop.f32.mrb[8].mxu0 }
 0x1f3   : > { %v1435_v31 = vadd.f32 %v1434_v52, %v1433_v23  ;;  %1299 = vst.msk [vmem:[#allocation2 + $0x50] sm:$0xff] %vm331_vm1, %v3503_v19  ;;  %v1161_v26 = vpop.f32.mrb[9].mxu0  ;;  %v1335_v42 = vadd.f32 %v1334_v41, %v1333_v24  ;;  %v1401_v30 = vmul.f32 %v3503_v19, %v3503_v19  ;;  %v1340_v48 = vsel %vm331_vm1, %v3503_v19, 0.0 }
 0x1f4   : > { %1297 = vst.msk [vmem:[#allocation2 + $0x40] sm:$0xff] %vm331_vm1, %v1161_v26  ;;  %v1336_v9 = vsel %vm331_vm1, %v1161_v26, 0.0  ;;  %v1399_v28 = vmul.f32 %v1161_v26, %v1161_v26  ;;  %v3504_v40 = vpop.f32.mrb[10].mxu0 }
 0x1f5   : > { %v1337_v53 = vadd.f32 %v1336_v9, %v1335_v42  ;;  %v1437_v58 = vadd.f32 %v1436_v4, %v1435_v31  ;;  %1300 = vst.msk [vmem:[#allocation2 + $0x58] sm:$0xff] %vm331_vm1, %v3504_v40  ;;  %v1164_v20 = vpop.f32.mrb[11].mxu0  ;;  %v1402_v2 = vmul.f32 %v3504_v40, %v3504_v40  ;;  %v1442_v0 = vsel %vm331_vm1, %v1401_v30, 0.0 }
 0x1f6   : > { %v1438_v37 = vsel %vm331_vm1, %v1399_v28, 0.0  ;;  %1298 = vst.msk [vmem:[#allocation2 + $0x48] sm:$0xff] %vm331_vm1, %v1164_v20  ;;  %v1338_v50 = vsel %vm331_vm1, %v1164_v20, 0.0  ;;  %v1400_v12 = vmul.f32 %v1164_v20, %v1164_v20  ;;  %v1342_v47 = vsel %vm331_vm1, %v3504_v40, 0.0 }
 0x1f7   : > { %v1439_v16 = vadd.f32 %v1438_v37, %v1437_v58  ;;  %v1339_v57 = vadd.f32 %v1338_v50, %v1337_v53  ;;  %v1444_v17 = vsel %vm331_vm1, %v1402_v2, 0.0 }
 0x1f8   : > { %v1440_v33 = vsel %vm331_vm1, %v1400_v12, 0.0 }
 0x1f9   : > { %v1341_v39 = vadd.f32 %v1340_v48, %v1339_v57  ;;  %v1441_v59 = vadd.f32 %v1440_v33, %v1439_v16 }
 0x1fa   : > { %v3507_v44 = vpop.f32.mrb[12].mxu0 }
 0x1fb   : > { %v1443_v63 = vadd.f32 %v1442_v0, %v1441_v59  ;;  %1303 = vst.msk [vmem:[#allocation2 + $0x70] sm:$0xff] %vm331_vm1, %v3507_v44  ;;  %v1177_v62 = vpop.f32.mrb[13].mxu0  ;;  %v1343_v15 = vadd.f32 %v1342_v47, %v1341_v39  ;;  %v1405_v32 = vmul.f32 %v3507_v44, %v3507_v44  ;;  %v1348_v8 = vsel %vm331_vm1, %v3507_v44, 0.0 }
 0x1fc   : > { %1301 = vst.msk [vmem:[#allocation2 + $0x60] sm:$0xff] %vm331_vm1, %v1177_v62  ;;  %v1344_v18 = vsel %vm331_vm1, %v1177_v62, 0.0  ;;  %v1403_v14 = vmul.f32 %v1177_v62, %v1177_v62  ;;  %v3508_v25 = vpop.f32.mrb[14].mxu0 }
 0x1fd   : > { %v1345_v27 = vadd.f32 %v1344_v18, %v1343_v15  ;;  %v1445_v38 = vadd.f32 %v1444_v17, %v1443_v63  ;;  %1304 = vst.msk [vmem:[#allocation2 + $0x78] sm:$0xff] %vm331_vm1, %v3508_v25  ;;  %v1180_v43 = vpop.f32.mrb[15].mxu0  ;;  %v1406_v49 = vmul.f32 %v3508_v25, %v3508_v25  ;;  %v1450_v56 = vsel %vm331_vm1, %v1405_v32, 0.0 }
 0x1fe   : > { %v1446_v45 = vsel %vm331_vm1, %v1403_v14, 0.0  ;;  %1302 = vst.msk [vmem:[#allocation2 + $0x68] sm:$0xff] %vm331_vm1, %v1180_v43  ;;  %v1346_v55 = vsel %vm331_vm1, %v1180_v43, 0.0  ;;  %v1404_v35 = vmul.f32 %v1180_v43, %v1180_v43  ;;  %v1350_v21 = vsel %vm331_vm1, %v3508_v25, 0.0 }
 0x1ff   : > { %v1447_v7 = vadd.f32 %v1446_v45, %v1445_v38  ;;  %v1347_v46 = vadd.f32 %v1346_v55, %v1345_v27  ;;  %v1452_v6 = vsel %vm331_vm1, %v1406_v49, 0.0 }
 0x200   : > { %v1448_v61 = vsel %vm331_vm1, %v1404_v35, 0.0 }
 0x201   : > { %v1349_v5 = vadd.f32 %v1348_v8, %v1347_v46  ;;  %v1449_v54 = vadd.f32 %v1448_v61, %v1447_v7 }
 0x202   : > { %v3511_v60 = vpop.f32.mrb[16].mxu0 }
 0x203   : > { %v1451_v3 = vadd.f32 %v1450_v56, %v1449_v54  ;;  %1307 = vst.msk [vmem:[#allocation2 + $0x90] sm:$0xff] %vm331_vm1, %v3511_v60  ;;  %v1193_v13 = vpop.f32.mrb[17].mxu0  ;;  %v1351_v10 = vadd.f32 %v1350_v21, %v1349_v5  ;;  %v1409_v52 = vmul.f32 %v3511_v60, %v3511_v60  ;;  %v1356_v4 = vsel %vm331_vm1, %v3511_v60, 0.0 }
 0x204   : > { %1305 = vst.msk [vmem:[#allocation2 + $0x80] sm:$0xff] %vm331_vm1, %v1193_v13  ;;  %v1352_v29 = vsel %vm331_vm1, %v1193_v13, 0.0  ;;  %v1407_v36 = vmul.f32 %v1193_v13, %v1193_v13  ;;  %v3512_v11 = vpop.f32.mrb[18].mxu0 }
 0x205   : > { %v1353_v22 = vadd.f32 %v1352_v29, %v1351_v10  ;;  %v1453_v24 = vadd.f32 %v1452_v6, %v1451_v3  ;;  %1308 = vst.msk [vmem:[#allocation2 + $0x98] sm:$0xff] %vm331_vm1, %v3512_v11  ;;  %v1196_v23 = vpop.f32.mrb[19].mxu0  ;;  %v1410_v9 = vmul.f32 %v3512_v11, %v3512_v11  ;;  %v1458_v58 = vsel %vm331_vm1, %v1409_v52, 0.0 }
 0x206   : > { %v1454_v41 = vsel %vm331_vm1, %v1407_v36, 0.0  ;;  %1306 = vst.msk [vmem:[#allocation2 + $0x88] sm:$0xff] %vm331_vm1, %v1196_v23  ;;  %v1354_v19 = vsel %vm331_vm1, %v1196_v23, 0.0  ;;  %v1408_v31 = vmul.f32 %v1196_v23, %v1196_v23  ;;  %v1358_v20 = vsel %vm331_vm1, %v3512_v11, 0.0 }
 0x207   : > { %v1455_v26 = vadd.f32 %v1454_v41, %v1453_v24  ;;  %v1355_v42 = vadd.f32 %v1354_v19, %v1353_v22  ;;  %v1460_v16 = vsel %vm331_vm1, %v1410_v9, 0.0 }
 0x208   : > { %v1456_v28 = vsel %vm331_vm1, %v1408_v31, 0.0 }
 0x209   : > { %v1357_v40 = vadd.f32 %v1356_v4, %v1355_v42  ;;  %v1457_v53 = vadd.f32 %v1456_v28, %v1455_v26 }
 0x20a   : > { %v3515_v30 = vpop.f32.mrb[20].mxu0 }
 0x20b   : > { %v1459_v37 = vadd.f32 %v1458_v58, %v1457_v53  ;;  %1311 = vst.msk [vmem:[#allocation2 + $0xb0] sm:$0xff] %vm331_vm1, %v3515_v30  ;;  %v1209_v50 = vpop.f32.mrb[21].mxu0  ;;  %v1359_v12 = vadd.f32 %v1358_v20, %v1357_v40  ;;  %v1413_v0 = vmul.f32 %v3515_v30, %v3515_v30  ;;  %v1364_v17 = vsel %vm331_vm1, %v3515_v30, 0.0 }
 0x20c   : > { %1309 = vst.msk [vmem:[#allocation2 + $0xa0] sm:$0xff] %vm331_vm1, %v1209_v50  ;;  %v1360_v57 = vsel %vm331_vm1, %v1209_v50, 0.0  ;;  %v1411_v48 = vmul.f32 %v1209_v50, %v1209_v50  ;;  %v3516_v2 = vpop.f32.mrb[22].mxu0 }
 0x20d   : > { %v1361_v33 = vadd.f32 %v1360_v57, %v1359_v12  ;;  %v1461_v39 = vadd.f32 %v1460_v16, %v1459_v37  ;;  %1312 = vst.msk [vmem:[#allocation2 + $0xb8] sm:$0xff] %vm331_vm1, %v3516_v2  ;;  %v1212_v59 = vpop.f32.mrb[23].mxu0  ;;  %v1414_v18 = vmul.f32 %v3516_v2, %v3516_v2  ;;  %v1466_v38 = vsel %vm331_vm1, %v1413_v0, 0.0 }
 0x20e   : > { %v1462_v47 = vsel %vm331_vm1, %v1411_v48, 0.0  ;;  %1310 = vst.msk [vmem:[#allocation2 + $0xa8] sm:$0xff] %vm331_vm1, %v1212_v59  ;;  %v1362_v44 = vsel %vm331_vm1, %v1212_v59, 0.0  ;;  %v1412_v63 = vmul.f32 %v1212_v59, %v1212_v59  ;;  %v1366_v43 = vsel %vm331_vm1, %v3516_v2, 0.0 }
 0x20f   : > { %v1463_v62 = vadd.f32 %v1462_v47, %v1461_v39  ;;  %v1363_v15 = vadd.f32 %v1362_v44, %v1361_v33  ;;  %v1468_v7 = vsel %vm331_vm1, %v1414_v18, 0.0 }
 0x210   : > { %v1464_v14 = vsel %vm331_vm1, %v1412_v63, 0.0 }
 0x211   : > { %v1365_v25 = vadd.f32 %v1364_v17, %v1363_v15  ;;  %v1465_v27 = vadd.f32 %v1464_v14, %v1463_v62 }
 0x212   : > { %v3519_v32 = vpop.f32.mrb[24].mxu0 }
 0x213   : > { %v1467_v45 = vadd.f32 %v1466_v38, %v1465_v27  ;;  %1315 = vst.msk [vmem:[#allocation2 + $0xd0] sm:$0xff] %vm331_vm1, %v3519_v32  ;;  %v1225_v55 = vpop.f32.mrb[25].mxu0  ;;  %v1367_v35 = vadd.f32 %v1366_v43, %v1365_v25  ;;  %v1417_v56 = vmul.f32 %v3519_v32, %v3519_v32  ;;  %v1372_v6 = vsel %vm331_vm1, %v3519_v32, 0.0 }
 0x214   : > { %1313 = vst.msk [vmem:[#allocation2 + $0xc0] sm:$0xff] %vm331_vm1, %v1225_v55  ;;  %v1368_v46 = vsel %vm331_vm1, %v1225_v55, 0.0  ;;  %v1415_v8 = vmul.f32 %v1225_v55, %v1225_v55  ;;  %v3520_v49 = vpop.f32.mrb[26].mxu0 }
 0x215   : > { %v1369_v61 = vadd.f32 %v1368_v46, %v1367_v35  ;;  %v1469_v5 = vadd.f32 %v1468_v7, %v1467_v45  ;;  %1316 = vst.msk [vmem:[#allocation2 + $0xd8] sm:$0xff] %vm331_vm1, %v3520_v49  ;;  %v1228_v54 = vpop.f32.mrb[27].mxu0  ;;  %v1418_v29 = vmul.f32 %v3520_v49, %v3520_v49  ;;  %v1474_v24 = vsel %vm331_vm1, %v1417_v56, 0.0  ;;  %v4457_v56 = vld [vmem:[#allocation2] sm:$0xff] }
 0x216   : > { %v1470_v21 = vsel %vm331_vm1, %v1415_v8, 0.0  ;;  %1314 = vst.msk [vmem:[#allocation2 + $0xc8] sm:$0xff] %vm331_vm1, %v1228_v54  ;;  %v1370_v60 = vsel %vm331_vm1, %v1228_v54, 0.0  ;;  %v1416_v3 = vmul.f32 %v1228_v54, %v1228_v54  ;;  %v1374_v23 = vsel %vm331_vm1, %v3520_v49, 0.0  ;;  %v4455_v54 = vld [vmem:[#allocation2 + $0x18] sm:$0xff] }
 0x217   : > { %v1471_v13 = vadd.f32 %v1470_v21, %v1469_v5  ;;  %v1371_v10 = vadd.f32 %v1370_v60, %v1369_v61  ;;  %v1476_v26 = vsel %vm331_vm1, %v1418_v29, 0.0  ;;  %v4453_v5 = vld [vmem:[#allocation2 + $0x10] sm:$0xff]  ;;  %v4459_v21 = vld [vmem:[#allocation2 + $0x8] sm:$0xff]  ;;  %v4461_v60 = vld [vmem:[#allocation2 + $0x20] sm:$0xff] }
 0x218   : > { %v1472_v36 = vsel %vm331_vm1, %v1416_v3, 0.0  ;;  %v4463_v3 = vld [vmem:[#allocation2 + $0x28] sm:$0xff]  ;;  %v4471_v29 = vld [vmem:[#allocation2 + $0x40] sm:$0xff] }
 0x219   : > { %v1373_v11 = vadd.f32 %v1372_v6, %v1371_v10  ;;  %v1473_v22 = vadd.f32 %v1472_v36, %v1471_v13  ;;  %v4465_v13 = vld [vmem:[#allocation2 + $0x30] sm:$0xff]  ;;  %v4467_v10 = vld [vmem:[#allocation2 + $0x38] sm:$0xff]  ;;  %v4473_v36 = vld [vmem:[#allocation2 + $0x48] sm:$0xff] }
 0x21a   : > { %v3523_v52 = vpop.f32.mrb[28].mxu0 }
 0x21b   : > { %v1475_v41 = vadd.f32 %v1474_v24, %v1473_v22  ;;  %1319 = vst.msk [vmem:[#allocation2 + $0xf0] sm:$0xff] %vm331_vm1, %v3523_v52  ;;  %v1241_v19 = vpop.f32.mrb[29].mxu0  ;;  %v1375_v31 = vadd.f32 %v1374_v23, %v1373_v11  ;;  %v1421_v58 = vmul.f32 %v3523_v52, %v3523_v52  ;;  %v1380_v16 = vsel %vm331_vm1, %v3523_v52, 0.0  ;;  %v4475_v11 = vld [vmem:[#allocation2 + $0x50] sm:$0xff]  ;;  %v4477_v22 = vld [vmem:[#allocation2 + $0x58] sm:$0xff] }
 0x21c   : > { %1317 = vst.msk [vmem:[#allocation2 + $0xe0] sm:$0xff] %vm331_vm1, %v1241_v19  ;;  %v1376_v42 = vsel %vm331_vm1, %v1241_v19, 0.0  ;;  %v1419_v4 = vmul.f32 %v1241_v19, %v1241_v19  ;;  %v3524_v9 = vpop.f32.mrb[30].mxu0  ;;  %v4487_v19 = vld [vmem:[#allocation2 + $0x60] sm:$0xff] }
 0x21d   : > { %v1377_v28 = vadd.f32 %v1376_v42, %v1375_v31  ;;  %v1477_v40 = vadd.f32 %v1476_v26, %v1475_v41  ;;  %1320 = vst.msk [vmem:[#allocation2 + $0xf8] sm:$0xff] %vm331_vm1, %v3524_v9  ;;  %v1244_v53 = vpop.f32.mrb[31].mxu0  ;;  %v1422_v57 = vmul.f32 %v3524_v9, %v3524_v9  ;;  %v1482_v39 = vsel %vm331_vm1, %v1421_v58, 0.0  ;;  %v4489_v31 = vld [vmem:[#allocation2 + $0x70] sm:$0xff]  ;;  %v4491_v26 = vld [vmem:[#allocation2 + $0x78] sm:$0xff] }
 0x21e   : > { %v1478_v20 = vsel %vm331_vm1, %v1419_v4, 0.0  ;;  %1318 = vst.msk [vmem:[#allocation2 + $0xe8] sm:$0xff] %vm331_vm1, %v1244_v53  ;;  %v1378_v30 = vsel %vm331_vm1, %v1244_v53, 0.0  ;;  %v1420_v37 = vmul.f32 %v1244_v53, %v1244_v53  ;;  %v1382_v59 = vsel %vm331_vm1, %v3524_v9, 0.0  ;;  %v4503_v53 = vld [vmem:[#allocation2 + $0x90] sm:$0xff] }
 0x21f   : > { %v1479_v50 = vadd.f32 %v1478_v20, %v1477_v40  ;;  %v1379_v12 = vadd.f32 %v1378_v30, %v1377_v28  ;;  %v1484_v44 = vsel %vm331_vm1, %v1422_v57, 0.0  ;;  %v4501_v40 = vld [vmem:[#allocation2 + $0x68] sm:$0xff]  ;;  %v4520_v57 = vld [vmem:[#allocation2 + $0x98] sm:$0xff] }
 0x220   : > { %v1480_v48 = vsel %vm331_vm1, %v1420_v37, 0.0  ;;  %v3775_v58 = vld [vmem:[%s5586_s2 + $0x8] sm:$0x3f]  }
 0x221   : > { %v1381_v2 = vadd.f32 %v1380_v16, %v1379_v12  ;;  %v1481_v33 = vadd.f32 %v1480_v48, %v1479_v50  ;;  %v4516_v12 = vld [vmem:[#allocation2 + $0x80] sm:$0xff]  ;;  %v4518_v16 = vld [vmem:[#allocation2 + $0x88] sm:$0xff]  ;;  %3758 = vmatprep.subr.msk.bf16.mxu1 %vm587_vm0, %v3775_v58 }
 0x223   : > { %v1383_v0 = vadd.f32 %v1382_v59, %v1381_v2  ;;  %v1483_v47 = vadd.f32 %v1482_v39, %v1481_v33  ;;  %v4528_v39 = vld [vmem:[#allocation2 + $0xa0] sm:$0xff]  ;;  %v4530_v59 = vld [vmem:[#allocation2 + $0xb0] sm:$0xff] }
 0x225   : > { %v1384_v63 = vrot.slane %v1383_v0, 4  ;;  %v1485_v62 = vadd.f32 %v1484_v44, %v1483_v47  ;;  %v2000_v47 = vsel %vm587_vm0, %v3775_v58, 0 }
 0x226   : > { %3526 = vmatpush3.bf16.msra.mxu1 %v2000_v47 }
 0x227   : > { %v1385_v15 = vadd.f32 %v1384_v63, %v1383_v0  ;;  %v1486_v17 = vrot.slane %v1485_v62, 4  ;;  %v4532_v0 = vld [vmem:[#allocation2 + $0xb8] sm:$0xff] }
 0x229   : > { %v1386_v18 = vrot.slane %v1385_v15, 2  ;;  %v1487_v14 = vadd.f32 %v1486_v17, %v1485_v62  ;;  %v4544_v17 = vld [vmem:[#allocation2 + $0xa8] sm:$0xff] }
 0x22b   : > { %v1387_v25 = vadd.f32 %v1386_v18, %v1385_v15  ;;  %v1488_v27 = vrot.slane %v1487_v14, 2  ;;  %v4546_v18 = vld [vmem:[#allocation2 + $0xc0] sm:$0xff] }
 0x22d   : > { %v1388_v38 = vrot.slane %v1387_v25, 1  ;;  %v1489_v43 = vadd.f32 %v1488_v27, %v1487_v14  ;;  %v4548_v14 = vld [vmem:[#allocation2 + $0xd0] sm:$0xff] }
 0x22f   : > { %v1389_v32 = vadd.f32 %v1388_v38, %v1387_v25  ;;  %v1490_v45 = vrot.slane %v1489_v43, 1 }
 0x231   : > { %v1491_v55 = vadd.f32 %v1490_v45, %v1489_v43  ;;  %v4449_v35 = vmul.f32 0.00390625, %v1389_v32  ;;  %v4558_v32 = vld [vmem:[#allocation2 + $0xc8] sm:$0xff]  ;;  %v4560_v45 = vld [vmem:[#allocation2 + $0xd8] sm:$0xff] }
 0x233   : > { %v1494_v7 = vmul.f32 0.00390625, %v1491_v55  ;;  %v1495_v46 = vmul.f32 %v4449_v35, %v4449_v35  ;;  %v1556_v6 = vsub.f32 %v4453_v5, %v4449_v35  ;;  %v1557_v24 = vsub.f32 %v4455_v54, %v4449_v35  ;;  %v4562_v55 = vld [vmem:[#allocation2 + $0xf0] sm:$0xff]  ;;  %v4574_v5 = vld [vmem:[#allocation2 + $0xe8] sm:$0xff]  ;;  %v4576_v54 = vld [vmem:[#allocation2 + $0xf8] sm:$0xff] }
 0x234   : > { %v1554_v23 = vsub.f32 %v4457_v56, %v4449_v35  ;;  %v1555_v52 = vsub.f32 %v4459_v21, %v4449_v35  ;;  %v1558_v41 = vsub.f32 %v4461_v60, %v4449_v35  ;;  %v1559_v42 = vsub.f32 %v4463_v3, %v4449_v35 }
 0x235   : > { %v1496_v8 = vsub.f32 %v1494_v7, %v1495_v46  ;;  %v1560_v4 = vsub.f32 %v4465_v13, %v4449_v35  ;;  %v1561_v9 = vsub.f32 %v4467_v10, %v4449_v35  ;;  %v1562_v28 = vsub.f32 %v4471_v29, %v4449_v35 }
 0x236   : > { %v1563_v20 = vsub.f32 %v4473_v36, %v4449_v35  ;;  %v1564_v30 = vsub.f32 %v4475_v11, %v4449_v35  ;;  %v1565_v37 = vsub.f32 %v4477_v22, %v4449_v35  ;;  %v1566_v50 = vsub.f32 %v4487_v19, %v4449_v35 }
 0x237   : > { %v1497_v49 = vmax.f32 %v1496_v8, 0.0  ;;  %v1567_v48 = vsub.f32 %v4501_v40, %v4449_v35  ;;  %v1568_v2 = vsub.f32 %v4489_v31, %v4449_v35  ;;  %v1569_v33 = vsub.f32 %v4491_v26, %v4449_v35 }
 0x238   : > { %v1570_v44 = vsub.f32 %v4516_v12, %v4449_v35  ;;  %v1571_v63 = vsub.f32 %v4518_v16, %v4449_v35  ;;  %v1572_v62 = vsub.f32 %v4503_v53, %v4449_v35  ;;  %v1573_v15 = vsub.f32 %v4520_v57, %v4449_v35 }
 0x239   : > { %v1498_v61 = vadd.f32 1e-05, %v1497_v49  ;;  %v1574_v25 = vsub.f32 %v4528_v39, %v4449_v35  ;;  %v1575_v27 = vsub.f32 %v4544_v17, %v4449_v35  ;;  %v5594_v57 = vsub.f32 %v4530_v59, %v4449_v35 }
 0x23a   : > { %v5596_v17 = vsub.f32 %v4546_v18, %v4449_v35 }
 0x23b   : > { %3778 = vrsqrt.f32 %v1498_v61  ;;  %v4572_v61 = vld [vmem:[#allocation2 + $0xe0] sm:$0xff] }
 0x245   : > { %v4578_v56 = vpop.eup %3778 }
 0x246   : > { %v1588_v10 = vmul.f32 %v4578_v56, %v1556_v6  ;;  %v1589_v36 = vmul.f32 %v4578_v56, %v1557_v24  ;;  %v1586_v58 = vmul.f32 %v4578_v56, %v1554_v23  ;;  %v1587_v47 = vmul.f32 %v4578_v56, %v1555_v52 }
 0x247   : > { %v1590_v51 = vmul.f32 %v4578_v56, %v1558_v41  ;;  %v1591_v21 = vmul.f32 %v4578_v56, %v1559_v42  ;;  %v1592_v60 = vmul.f32 %v4578_v56, %v1560_v4  ;;  %v1593_v49 = vmul.f32 %v4578_v56, %v1561_v9  ;;  %v4608_v42 = vld [vmem:[%s5586_s2] sm:$0x3f]  }
 0x248   : > { %v1620_v3 = vmax.f32 %v1588_v10, 0.0  ;;  %v1621_v8 = vmax.f32 %v1589_v36, 0.0  ;;  %v1618_v46 = vmax.f32 %v1586_v58, 0.0  ;;  %v1619_v13 = vmax.f32 %v1587_v47, 0.0  ;;  %3759 = vmatprep.subr.msk.bf16.mxu1 %vm587_vm0, %v4608_v42 }
 0x249   : > { %v1622_v7 = vmax.f32 %v1590_v51, 0.0  ;;  %v1623_v6 = vmax.f32 %v1591_v21, 0.0  ;;  %v1624_v43 = vmax.f32 %v1592_v60, 0.0  ;;  %v1625_v24 = vmax.f32 %v1593_v49, 0.0 }
 0x24a   : > { %v4596_v38 = vpack.c.bf16 %v1621_v8, %v1620_v3  ;;  %v4598_v23 = vpack.c.bf16 %v1619_v13, %v1618_v46  ;;  %v1594_v52 = vmul.f32 %v4578_v56, %v1562_v28  ;;  %v1595_v41 = vmul.f32 %v4578_v56, %v1563_v20 }
 0x24b   : > { %v4610_v51 = vpack.c.bf16 %v1623_v6, %v1622_v7  ;;  %v4612_v4 = vpack.c.bf16 %v1625_v24, %v1624_v43  ;;  %v1596_v9 = vmul.f32 %v4578_v56, %v1564_v30  ;;  %v1597_v29 = vmul.f32 %v4578_v56, %v1565_v37 }
 0x24c   : > { %1686 = vrot.lane.b32.xlu1 %v4596_v38, %s3791_s23  ;;  %1684 = vrot.lane.b32.xlu0 %v4598_v23, %s3791_s23  ;;  %v1626_v28 = vmax.f32 %v1594_v52, 0.0  ;;  %v1627_v20 = vmax.f32 %v1595_v41, 0.0  ;;  %v1598_v11 = vmul.f32 %v4578_v56, %v1566_v50  ;;  %v1599_v22 = vmul.f32 %v4578_v56, %v1567_v48 }
 0x24d   : > { %v1628_v30 = vmax.f32 %v1596_v9, 0.0  ;;  %v1629_v37 = vmax.f32 %v1597_v29, 0.0  ;;  %v1600_v43 = vmul.f32 %v4578_v56, %v1568_v2  ;;  %v1601_v7 = vmul.f32 %v4578_v56, %v1569_v33 }
 0x24e   : > { %v4644_v19 = vpack.c.bf16 %v1627_v20, %v1626_v28  ;;  %v1630_v40 = vmax.f32 %v1598_v11, 0.0  ;;  %v1631_v50 = vmax.f32 %v1599_v22, 0.0  ;;  %v1602_v48 = vmul.f32 %v4578_v56, %v1570_v44 }
 0x24f   : > { %v4650_v31 = vpack.c.bf16 %v1629_v37, %v1628_v30  ;;  %v1632_v2 = vmax.f32 %v1600_v43, 0.0  ;;  %v1633_v46 = vmax.f32 %v1601_v7, 0.0  ;;  %v1603_v26 = vmul.f32 %v4578_v56, %v1571_v63 }
 0x250   : > { %1719 = vrot.lane.b32.xlu1 %v4610_v51, %s3790_s22  ;;  %1717 = vrot.lane.b32.xlu0 %v4596_v38, %s3790_s22  ;;  %v4660_v33 = vpack.c.bf16 %v1631_v50, %v1630_v40  ;;  %v1634_v12 = vmax.f32 %v1602_v48, 0.0  ;;  %v1604_v44 = vmul.f32 %v4578_v56, %v1572_v62  ;;  %v1605_v16 = vmul.f32 %v4578_v56, %v1573_v15 }
 0x251   : > { %v4670_v63 = vpack.c.bf16 %v1633_v46, %v1632_v2  ;;  %v1635_v8 = vmax.f32 %v1603_v26, 0.0  ;;  %v1606_v49 = vmul.f32 %v4578_v56, %v1574_v25  ;;  %v1607_v53 = vmul.f32 %v4578_v56, %v1575_v27 }
 0x252   : > { %v1636_v21 = vmax.f32 %v1604_v44, 0.0  ;;  %v1637_v62 = vmax.f32 %v1605_v16, 0.0  ;;  %v1608_v15 = vmul.f32 %v4578_v56, %v5594_v57  ;;  %v5595_v60 = vsub.f32 %v4532_v0, %v4449_v35 }
 0x253   : > { %v4688_v39 = vpack.c.bf16 %v1635_v8, %v1634_v12  ;;  %v1638_v25 = vmax.f32 %v1606_v49, 0.0  ;;  %v1639_v13 = vmax.f32 %v1607_v53, 0.0  ;;  %v1610_v27 = vmul.f32 %v4578_v56, %v5596_v17  ;;  %v4802_v53 = vld [vmem:[%s5586_s2 + $0x10] sm:$0x3f]  }
 0x254   : > { %v1609_v3 = vmul.f32 %v4578_v56, %v5595_v60  ;;  %1690 = vrot.lane.b32.xlu1 %v4612_v4, %s3791_s23  ;;  %1688 = vrot.lane.b32.xlu0 %v4610_v51, %s3791_s23  ;;  %v4698_v59 = vpack.c.bf16 %v1637_v62, %v1636_v21  ;;  %v1640_v0 = vmax.f32 %v1608_v15, 0.0  ;;  %v5597_v36 = vsub.f32 %v4558_v32, %v4449_v35 }
 0x255   : > { %v4704_v47 = vpack.c.bf16 %v1639_v13, %v1638_v25  ;;  %v1642_v18 = vmax.f32 %v1610_v27, 0.0  ;;  %v5598_v6 = vsub.f32 %v4548_v14, %v4449_v35  ;;  %v5599_v52 = vsub.f32 %v4560_v45, %v4449_v35 }
 0x256   : > { %v1641_v10 = vmax.f32 %v1609_v3, 0.0  ;;  %v1611_v58 = vmul.f32 %v4578_v56, %v5597_v36  ;;  %v5600_v32 = vsub.f32 %v4572_v61, %v4449_v35  ;;  %v5601_v20 = vsub.f32 %v4574_v5, %v4449_v35 }
 0x257   : > { %v1612_v24 = vmul.f32 %v4578_v56, %v5598_v6  ;;  %v1613_v41 = vmul.f32 %v4578_v56, %v5599_v52  ;;  %v5602_v45 = vsub.f32 %v4562_v55, %v4449_v35  ;;  %v5603_v37 = vsub.f32 %v4576_v54, %v4449_v35 }
 0x258   : > { %v4714_v9 = vpack.c.bf16 %v1641_v10, %v1640_v0  ;;  %v1643_v29 = vmax.f32 %v1611_v58, 0.0  ;;  %v1614_v28 = vmul.f32 %v4578_v56, %v5600_v32  ;;  %v1615_v14 = vmul.f32 %v4578_v56, %v5601_v20  ;;  %1723 = vrot.lane.b32.xlu1 %v4644_v19, %s3790_s22  ;;  %1721 = vrot.lane.b32.xlu0 %v4612_v4, %s3790_s22 }
 0x259   : > { %v1644_v11 = vmax.f32 %v1612_v24, 0.0  ;;  %v1645_v22 = vmax.f32 %v1613_v41, 0.0  ;;  %v1616_v30 = vmul.f32 %v4578_v56, %v5602_v45  ;;  %v1617_v43 = vmul.f32 %v4578_v56, %v5603_v37 }
 0x25a   : > { %v4736_v61 = vpack.c.bf16 %v1643_v29, %v1642_v18  ;;  %v1646_v5 = vmax.f32 %v1614_v28, 0.0  ;;  %v1647_v7 = vmax.f32 %v1615_v14, 0.0  ;;  %v5604_v35 = vmov 0.0|0.0  }
 0x25b   : > { %v4738_v40 = vpack.c.bf16 %v1645_v22, %v1644_v11  ;;  %v1648_v55 = vmax.f32 %v1616_v30, 0.0  ;;  %v1649_v50 = vmax.f32 %v1617_v43, 0.0  ;;  %v2217_v49 = vsel %vm587_vm0, %v4608_v42, 0 }
 0x25c   : > { %v4740_v48 = vpack.c.bf16 %v1647_v7, %v1646_v5  ;;  %1694 = vrot.lane.b32.xlu1 %v4650_v31, %s3791_s23  ;;  %1692 = vrot.lane.b32.xlu0 %v4644_v19, %s3791_s23 }
 0x25d   : > { %v1666_v2 = vpack.c.bf16 %v1649_v50, %v1648_v55 }
 0x260   : > { %1727 = vrot.lane.b32.xlu1 %v4660_v33, %s3790_s22  ;;  %1725 = vrot.lane.b32.xlu0 %v4650_v31, %s3790_s22 }
 0x264   : > { %1698 = vrot.lane.b32.xlu1 %v4670_v63, %s3791_s23  ;;  %1696 = vrot.lane.b32.xlu0 %v4660_v33, %s3791_s23 }
 0x268   : > { %1731 = vrot.lane.b32.xlu1 %v4688_v39, %s3790_s22  ;;  %1729 = vrot.lane.b32.xlu0 %v4670_v63, %s3790_s22 }
 0x26c   : > { %1702 = vrot.lane.b32.xlu1 %v4698_v59, %s3791_s23  ;;  %1700 = vrot.lane.b32.xlu0 %v4688_v39, %s3791_s23 }
 0x270   : > { %1735 = vrot.lane.b32.xlu1 %v4704_v47, %s3790_s22  ;;  %1733 = vrot.lane.b32.xlu0 %v4698_v59, %s3790_s22 }
 0x274   : > { %1706 = vrot.lane.b32.xlu1 %v4714_v9, %s3791_s23  ;;  %1704 = vrot.lane.b32.xlu0 %v4704_v47, %s3791_s23 }
 0x278   : > { %1739 = vrot.lane.b32.xlu1 %v4736_v61, %s3790_s22  ;;  %1737 = vrot.lane.b32.xlu0 %v4714_v9, %s3790_s22 }
 0x27c   : > { %1710 = vrot.lane.b32.xlu1 %v4738_v40, %s3791_s23  ;;  %1708 = vrot.lane.b32.xlu0 %v4736_v61, %s3791_s23 }
 0x280   : > { %1741 = vrot.lane.b32.xlu0 %v4738_v40, %s3790_s22  ;;  %1743 = vrot.lane.b32.xlu1 %v4740_v48, %s3790_s22 }
 0x284   : > { %1712 = vrot.lane.b32.xlu0 %v4740_v48, %s3791_s23  ;;  %1714 = vrot.lane.b32.xlu1 %v1666_v2, %s3791_s23 }
 0x288   : > { %1745 = vrot.lane.b32.xlu0 %v1666_v2, %s3790_s22  ;;  %1747 = vrot.lane.b32.xlu1 %v5604_v35, %s3790_s22 }
 0x2be   : > { %v1687_v54 = vpop.permute.xlu1 %1686  ;;  %v1685_v56 = vpop.permute.xlu0 %1684 }
 0x2bf   : > { %v1754_v46 = vsel %vm331_vm1, %v4598_v23, %v1687_v54  ;;  %v1751_v26 = vsel %vm331_vm1, 0.0|0.0, %v1685_v56 }
 0x2c2   : > { %v1720_v12 = vpop.permute.xlu1 %1719  ;;  %v1718_v44 = vpop.permute.xlu0 %1717 }
 0x2c3   : > { %v4792_v16 = vsel %vm380_vm2, %v1754_v46, %v1720_v12  ;;  %v4795_v8 = vsel %vm380_vm2, %v1751_v26, %v1718_v44 }
 0x2c4   : > { %3527 = vmatprep.mubr.msk.bf16.mxu1 %vm554_vm3, %v4795_v8  ;;  %v1835_v26 = vshrl.u32 %v4792_v16, 16 }
 0x2c5   : > { %3528 = vmatmul.mubr.msk.bf16.vlgmr.msra.gmra.mrb[0].mxu1 %vm554_vm3, %v4792_v16 }
 0x2c6   : > { %3560 = vmatpush3.bf16.msra.mxu1 %v2217_v49  ;;  %v1691_v23 = vpop.permute.xlu1 %1690  ;;  %v1689_v21 = vpop.permute.xlu0 %1688 }
 0x2c7   : > { %3760 = vmatprep.subr.msk.bf16.mxu1 %vm587_vm0, %v4802_v53  ;;  %v1760_v42 = vsel %vm331_vm1, %v4610_v51, %v1691_v23  ;;  %v1757_v62 = vsel %vm331_vm1, %v4596_v38, %v1689_v21 }
 0x2ca   : > { %v1724_v57 = vpop.permute.xlu1 %1723  ;;  %v1722_v15 = vpop.permute.xlu0 %1721 }
 0x2cb   : > { %v4815_v60 = vsel %vm380_vm2, %v1760_v42, %v1724_v57  ;;  %v4818_v3 = vsel %vm380_vm2, %v1757_v62, %v1722_v15  ;;  %v1837_v15 = vrot.slane %v1835_v26, 7 }
 0x2cc   : > { %3531 = vmatprep.mubr.msk.bf16.mxu1 %vm554_vm3, %v4818_v3  ;;  %v1841_v12 = vshrl.u32 %v4818_v3, 16 }
 0x2cd   : > { %3532 = vmatmul.mubr.msk.bf16.gmra.mrb[4].mxu1 %vm554_vm3, %v4815_v60 }
 0x2ce   : > { %v1695_v25 = vpop.permute.xlu1 %1694  ;;  %v1693_v13 = vpop.permute.xlu0 %1692 }
 0x2cf   : > { %v1766_v51 = vsel %vm331_vm1, %v4644_v19, %v1695_v25  ;;  %v1763_v38 = vsel %vm331_vm1, %v4612_v4, %v1693_v13  ;;  %v1838_v25 = vshll.u32 %v4792_v16, 16  ;;  %v1844_v13 = vshll.u32 %v4818_v3, 16 }
 0x2d2   : > { %v1728_v17 = vpop.permute.xlu1 %1727  ;;  %v1726_v27 = vpop.permute.xlu0 %1725 }
 0x2d3   : > { %v4829_v0 = vsel %vm380_vm2, %v1766_v51, %v1728_v17  ;;  %v4832_v10 = vsel %vm380_vm2, %v1763_v38, %v1726_v27  ;;  %v1840_v51 = vor.u32 %v1838_v25, %v1837_v15  ;;  %v1847_v38 = vshrl.u32 %v4815_v60, 16 }
 0x2d4   : > { %3535 = vmatprep.mubr.msk.bf16.mxu1 %vm554_vm3, %v4832_v10  ;;  %v1853_v17 = vshrl.u32 %v4832_v10, 16 }
 0x2d5   : > { %3536 = vmatmul.mubr.msk.bf16.gmra.mrb[8].mxu1 %vm554_vm3, %v4829_v0 }
 0x2d6   : > { %v1699_v36 = vpop.permute.xlu1 %1698  ;;  %v1697_v58 = vpop.permute.xlu0 %1696 }
 0x2d7   : > { %v1772_v19 = vsel %vm331_vm1, %v4660_v33, %v1699_v36  ;;  %v1769_v4 = vsel %vm331_vm1, %v4650_v31, %v1697_v58  ;;  %v2501_v36 = vsel %vm587_vm0, %v4802_v53, 0  ;;  %v1942_v58 = vsel %vm4088_vm6, 0, %v1840_v51 }
 0x2d8   : > { %v1856_v53 = vshll.u32 %v4832_v10, 16 }
 0x2da   : > { %v1732_v18 = vpop.permute.xlu1 %1731  ;;  %v1730_v6 = vpop.permute.xlu0 %1729 }
 0x2db   : > { %v4843_v24 = vsel %vm380_vm2, %v1772_v19, %v1732_v18  ;;  %v4846_v52 = vsel %vm380_vm2, %v1769_v4, %v1730_v6  ;;  %v1849_v19 = vrot.slane %v1847_v38, 7  ;;  %v1855_v4 = vrot.slane %v1853_v17, 7 }
 0x2dc   : > { %3539 = vmatprep.mubr.msk.bf16.mxu1 %vm554_vm3, %v4846_v52  ;;  %v1850_v6 = vshll.u32 %v4815_v60, 16 }
 0x2dd   : > { %3540 = vmatmul.mubr.msk.bf16.gmra.mrb[12].mxu1 %vm554_vm3, %v4843_v24 }
 0x2de   : > { %v1703_v41 = vpop.permute.xlu1 %1702  ;;  %v1701_v29 = vpop.permute.xlu0 %1700 }
 0x2df   : > { %v1778_v33 = vsel %vm331_vm1, %v4688_v39, %v1703_v41  ;;  %v1775_v31 = vsel %vm331_vm1, %v4670_v63, %v1701_v29  ;;  %v1859_v41 = vshrl.u32 %v4829_v0, 16  ;;  %v1852_v29 = vor.u32 %v1850_v6, %v1849_v19 }
 0x2e2   : > { %v1736_v32 = vpop.permute.xlu1 %1735  ;;  %v1734_v28 = vpop.permute.xlu0 %1733 }
 0x2e3   : > { %v4857_v20 = vsel %vm380_vm2, %v1778_v33, %v1736_v32  ;;  %v4860_v14 = vsel %vm380_vm2, %v1775_v31, %v1734_v28  ;;  %v1865_v33 = vshrl.u32 %v4846_v52, 16  ;;  %v1858_v31 = vor.u32 %v1856_v53, %v1855_v4 }
 0x2e4   : > { %3543 = vmatprep.mubr.msk.bf16.mxu1 %vm554_vm3, %v4860_v14  ;;  %v1861_v32 = vrot.slane %v1859_v41, 7  ;;  %v1944_v28 = vsel %vm4088_vm6, 0, %v1852_v29 }
 0x2e5   : > { %3544 = vmatmul.mubr.msk.bf16.gmra.mrb[16].mxu1 %vm554_vm3, %v4857_v20 }
 0x2e6   : > { %v1707_v11 = vpop.permute.xlu1 %1706  ;;  %v1705_v22 = vpop.permute.xlu0 %1704 }
 0x2e7   : > { %v1784_v39 = vsel %vm331_vm1, %v4704_v47, %v1707_v11  ;;  %v1781_v63 = vsel %vm331_vm1, %v4698_v59, %v1705_v22  ;;  %v1829_v47 = vshrl.u32 %v4795_v8, 16  ;;  %v1867_v11 = vrot.slane %v1865_v33, 7 }
 0x2e8   : > { %v1945_v22 = vsel %vm4088_vm6, 0, %v1858_v31 }
 0x2e9   : > { %v1831_v56 = vrot.slane %v1829_v47, 7 }
 0x2ea   : > { %v1740_v45 = vpop.permute.xlu1 %1739  ;;  %v1738_v30 = vpop.permute.xlu0 %1737 }
 0x2eb   : > { %v4871_v37 = vsel %vm380_vm2, %v1784_v39, %v1740_v45  ;;  %v4874_v43 = vsel %vm380_vm2, %v1781_v63, %v1738_v30  ;;  %v1862_v39 = vshll.u32 %v4829_v0, 16  ;;  %v1868_v63 = vshll.u32 %v4846_v52, 16 }
 0x2ec   : > { %3547 = vmatprep.mubr.msk.bf16.mxu1 %vm554_vm3, %v4874_v43  ;;  %v1871_v45 = vshrl.u32 %v4843_v24, 16  ;;  %v1892_v51 = vshll.u32 %v4874_v43, 16 }
 0x2ed   : > { %3548 = vmatmul.mubr.msk.bf16.gmra.mrb[20].mxu1 %vm554_vm3, %v4871_v37  ;;  %v1864_v30 = vor.u32 %v1862_v39, %v1861_v32  ;;  %v1898_v32 = vshll.u32 %v4871_v37, 16 }
 0x2ee   : > { %v1711_v5 = vpop.permute.xlu1 %1710  ;;  %v1709_v7 = vpop.permute.xlu0 %1708 }
 0x2ef   : > { %v1790_v59 = vsel %vm331_vm1, %v4736_v61, %v1711_v5  ;;  %v1787_v55 = vsel %vm331_vm1, %v4714_v9, %v1709_v7  ;;  %v1832_v9 = vshll.u32 %v4795_v8, 16  ;;  %v1877_v5 = vshrl.u32 %v4860_v14, 16 }
 0x2f0   : > { %v1870_v7 = vor.u32 %v1868_v63, %v1867_v11 }
 0x2f1   : > { %v1834_v44 = vor.u32 %v1832_v9, %v1831_v56  ;;  %v1874_v56 = vshll.u32 %v4843_v24, 16 }
 0x2f2   : > { %v1742_v50 = vpop.permute.xlu0 %1741  ;;  %v1744_v2 = vpop.permute.xlu1 %1743 }
 0x2f3   : > { %v4886_v35 = vsel %vm380_vm2, %v1787_v55, %v1742_v50  ;;  %v4889_v54 = vsel %vm380_vm2, %v1790_v59, %v1744_v2  ;;  %v1873_v59 = vrot.slane %v1871_v45, 7  ;;  %v1946_v55 = vsel %vm4088_vm6, 0, %v1864_v30 }
 0x2f4   : > { %3551 = vmatprep.mubr.msk.bf16.mxu1 %vm554_vm3, %v4886_v35  ;;  %v1879_v50 = vrot.slane %v1877_v5, 7  ;;  %v1947_v2 = vsel %vm4088_vm6, 0, %v1870_v7  ;;  %v1907_v11 = vshrl.u32 %v4889_v54, 16 }
 0x2f5   : > { %3552 = vmatmul.mubr.msk.bf16.gmra.mrb[24].mxu1 %vm554_vm3, %v4889_v54 }
 0x2f6   : > { %v1713_v61 = vpop.permute.xlu0 %1712  ;;  %v1715_v46 = vpop.permute.xlu1 %1714 }
 0x2f7   : > { %v1793_v49 = vsel %vm331_vm1, %v4738_v40, %v1713_v61  ;;  %v1796_v23 = vsel %vm331_vm1, %v4740_v48, %v1715_v46  ;;  %v1843_v40 = vrot.slane %v1841_v12, 7  ;;  %v1941_v48 = vsel %vm4088_vm6, 0, %v1834_v44 }
 0x2f8   : > { %v1880_v61 = vshll.u32 %v4860_v14, 16  ;;  %v1883_v46 = vshrl.u32 %v4857_v20, 16  ;;  %v1876_v44 = vor.u32 %v1874_v56, %v1873_v59  ;;  %v1909_v59 = vrot.slane %v1907_v11, 7 }
 0x2f9   : > { %v1846_v27 = vor.u32 %v1844_v13, %v1843_v40 }
 0x2fa   : > { %v1746_v21 = vpop.permute.xlu0 %1745  ;;  %v1748_v42 = vpop.permute.xlu1 %1747 }
 0x2fb   : > { %v4907_v62 = vsel %vm380_vm2, %v1793_v49, %v1746_v21  ;;  %v4910_v57 = vsel %vm380_vm2, %v1796_v23, %v1748_v42  ;;  %v1943_v18 = vsel %vm4088_vm6, 0, %v1846_v27  ;;  %v1889_v49 = vshrl.u32 %v4874_v43, 16 }
 0x2fc   : > { %3555 = vmatprep.mubr.msk.bf16.mxu1 %vm554_vm3, %v4907_v62  ;;  %v1882_v23 = vor.u32 %v1880_v61, %v1879_v50  ;;  %v1885_v21 = vrot.slane %v1883_v46, 7  ;;  %v1948_v42 = vsel %vm4088_vm6, 0, %v1876_v44  ;;  %v1895_v27 = vshrl.u32 %v4871_v37, 16 }
 0x2fd   : > { %3556 = vmatmul.mubr.msk.bf16.gmra.mrb[28].mxu1 %vm554_vm3, %v4910_v57  ;;  %v1891_v15 = vrot.slane %v1889_v49, 7  ;;  %v1913_v30 = vshrl.u32 %v4907_v62, 16  ;;  %v1910_v44 = vshll.u32 %v4889_v54, 16 }
 0x2fe   : > { %3561 = vmatprep.mubr.msk.bf16.mxu1 %vm554_vm3, %v1941_v48  ;;  %v1949_v40 = vsel %vm4088_vm6, 0, %v1882_v23  ;;  %v1886_v48 = vshll.u32 %v4857_v20, 16  ;;  %v1897_v4 = vrot.slane %v1895_v27, 7  ;;  %v1916_v23 = vshll.u32 %v4907_v62, 16 }
 0x2ff   : > { %v1894_v19 = vor.u32 %v1892_v51, %v1891_v15  ;;  %v1915_v50 = vrot.slane %v1913_v30, 7 }
 0x301   : > { %v1951_v31 = vsel %vm4088_vm6, 0, %v1894_v19  ;;  %v1918_v15 = vor.u32 %v1916_v23, %v1915_v50  ;;  %v2380_v19 = vrot.slane %v1832_v9, 1  ;;  %v2384_v9 = vrot.slane %v1844_v13, 1 }
 0x302   : > { %v2388_v13 = vrot.slane %v1856_v53, 1 }
 0x304   : > { %v2389_v3 = vor.u32 %v2388_v13, %v1853_v17 }
 0x305   : > { %3562 = vmatmul.mubr.msk.bf16.vlgmr.msra.gmra.mrb[0].mxu1 %vm554_vm3, %v1942_v58  ;;  %v1901_v58 = vshrl.u32 %v4886_v35, 16 }
 0x306   : > { %3594 = vmatpush3.bf16.msra.mxu1 %v2501_v36  ;;  %3565 = vmatprep.mubr.msk.bf16.mxu1 %vm554_vm3, %v1943_v18  ;;  %v1888_v36 = vor.u32 %v1886_v48, %v1885_v21  ;;  %v1919_v21 = vshrl.u32 %v4910_v57, 16  ;;  %v2432_v53 = vsel %vm4238_vm9, %v2389_v3, 0 }
 0x307   : > { %v1903_v29 = vrot.slane %v1901_v58, 7 }
 0x308   : > { %v1950_v18 = vsel %vm4088_vm6, 0, %v1888_v36 }
 0x30d   : > { %3566 = vmatmul.mubr.msk.bf16.gmra.mrb[4].mxu1 %vm554_vm3, %v1944_v28  ;;  %v1904_v28 = vshll.u32 %v4886_v35, 16 }
 0x30e   : > { %3569 = vmatprep.mubr.msk.bf16.mxu1 %vm554_vm3, %v1945_v22  ;;  %v1900_v22 = vor.u32 %v1898_v32, %v1897_v4  ;;  %v1955_v4 = vsel %vm4088_vm6, 0, %v1918_v15 }
 0x30f   : > { %v1906_v7 = vor.u32 %v1904_v28, %v1903_v29 }
 0x315   : > { %3570 = vmatmul.mubr.msk.bf16.gmra.mrb[8].mxu1 %vm554_vm3, %v1946_v55  ;;  %v1952_v55 = vsel %vm4088_vm6, 0, %v1900_v22  ;;  %v2382_v22 = vrot.slane %v1838_v25, 1  ;;  %v2386_v25 = vrot.slane %v1850_v6, 1  ;;  %v2392_v6 = vrot.slane %v1868_v63, 1 }
 0x316   : > { %3573 = vmatprep.mubr.msk.bf16.mxu1 %vm554_vm3, %v1947_v2  ;;  %v1953_v2 = vsel %vm4088_vm6, 0, %v1906_v7 }
 0x317   : > { %v2383_v8 = vor.u32 %v2382_v22, %v1835_v26  ;;  %v2387_v16 = vor.u32 %v2386_v25, %v1847_v38  ;;  %v2390_v26 = vrot.slane %v1862_v39, 1  ;;  %v2393_v10 = vor.u32 %v2392_v6, %v1865_v33 }
 0x318   : > { %v2394_v38 = vrot.slane %v1874_v56, 1  ;;  %v2396_v39 = vrot.slane %v1880_v61, 1  ;;  %v2400_v56 = vrot.slane %v1892_v51, 1 }
 0x319   : > { %v2429_v1 = vsel %vm4238_vm9, %v2383_v8, 0  ;;  %v2391_v60 = vor.u32 %v2390_v26, %v1859_v41  ;;  %v2434_v63 = vsel %vm4238_vm9, %v2393_v10, 0  ;;  %v2398_v41 = vrot.slane %v1886_v48, 1 }
 0x31a   : > { %v2395_v0 = vor.u32 %v2394_v38, %v1871_v45  ;;  %v2397_v52 = vor.u32 %v2396_v39, %v1877_v5  ;;  %v2401_v14 = vor.u32 %v2400_v56, %v1889_v49  ;;  %v2402_v45 = vrot.slane %v1898_v32, 1 }
 0x31b   : > { %v2433_v17 = vsel %vm4238_vm9, %v2391_v60, 0  ;;  %v2399_v24 = vor.u32 %v2398_v41, %v1883_v46  ;;  %v2404_v48 = vrot.slane %v1904_v28, 1  ;;  %v2406_v46 = vrot.slane %v1910_v44, 1 }
 0x31c   : > { %v2435_v33 = vsel %vm4238_vm9, %v2395_v0, 0  ;;  %v2436_v61 = vsel %vm4238_vm9, %v2397_v52, 0  ;;  %v2438_v51 = vsel %vm4238_vm9, %v2401_v14, 0  ;;  %v2403_v20 = vor.u32 %v2402_v45, %v1895_v27 }
 0x31d   : > { %3574 = vmatmul.mubr.msk.bf16.gmra.mrb[12].mxu1 %vm554_vm3, %v1948_v42  ;;  %v1912_v42 = vor.u32 %v1910_v44, %v1909_v59  ;;  %v2437_v5 = vsel %vm4238_vm9, %v2399_v24, 0  ;;  %v2405_v43 = vor.u32 %v2404_v48, %v1901_v58  ;;  %v2408_v32 = vrot.slane %v1916_v23, 1 }
 0x31e   : > { %3577 = vmatprep.mubr.msk.bf16.mxu1 %vm554_vm3, %v1949_v40  ;;  %v1921_v40 = vrot.slane %v1919_v21, 7  ;;  %v2439_v49 = vsel %vm4238_vm9, %v2403_v20, 0  ;;  %v2407_v37 = vor.u32 %v2406_v46, %v1907_v11 }
 0x31f   : > { %v1954_v36 = vsel %vm4088_vm6, 0, %v1912_v42  ;;  %v2440_v28 = vsel %vm4238_vm9, %v2405_v43, 0  ;;  %v2409_v35 = vor.u32 %v2408_v32, %v1913_v30 }
 0x320   : > { %v2441_v58 = vsel %vm4238_vm9, %v2407_v37, 0 }
 0x321   : > { %v2442_v50 = vsel %vm4238_vm9, %v2409_v35, 0 }
 0x325   : > { %3578 = vmatmul.mubr.msk.bf16.gmra.mrb[16].mxu1 %vm554_vm3, %v1950_v18  ;;  %v1922_v18 = vshll.u32 %v4910_v57, 16 }
 0x326   : > { %3581 = vmatprep.mubr.msk.bf16.mxu1 %vm554_vm3, %v1951_v31  ;;  %v2381_v31 = vor.u32 %v2380_v19, %v1829_v47  ;;  %v2385_v47 = vor.u32 %v2384_v9, %v1841_v12  ;;  %v2431_v12 = vsel %vm4238_vm9, %v2387_v16, 0 }
 0x327   : > { %v1924_v29 = vor.u32 %v1922_v18, %v1921_v40  ;;  %v2410_v27 = vrot.slane %v1922_v18, 1 }
 0x328   : > { %v2428_v59 = vsel %vm4238_vm9, %v2381_v31, 0 }
 0x329   : > { %v1956_v7 = vsel %vm4088_vm6, 0, %v1924_v29 }
 0x32d   : > { %3582 = vmatmul.mubr.msk.bf16.gmra.mrb[20].mxu1 %vm554_vm3, %v1952_v55  ;;  %v2430_v55 = vsel %vm4238_vm9, %v2385_v47, 0 }
 0x32e   : > { %3585 = vmatprep.mubr.msk.bf16.mxu1 %vm554_vm3, %v1953_v2  ;;  %v2411_v2 = vor.u32 %v2410_v27, %v1919_v21 }
 0x330   : > { %v2443_v54 = vsel %vm4238_vm9, %v2411_v2, 0 }
 0x335   : > { %3586 = vmatmul.mubr.msk.bf16.gmra.mrb[24].mxu1 %vm554_vm3, %v1954_v36 }
 0x336   : > { %3589 = vmatprep.mubr.msk.bf16.mxu1 %vm554_vm3, %v1955_v4 }
 0x33d   : > { %3590 = vmatmul.mubr.msk.bf16.gmra.mrb[28].mxu1 %vm554_vm3, %v1956_v7 }
 0x33e   : > { %3595 = vmatprep.mubr.msk.bf16.mxu1 %vm554_vm3, %v2428_v59 }
 0x345   : > { %3596 = vmatmul.mubr.msk.bf16.vlgmr.msra.gmra.mrb[0].mxu1 %vm554_vm3, %v2429_v1 }
 0x346   : > { %3599 = vmatprep.mubr.msk.bf16.mxu1 %vm554_vm3, %v2430_v55 }
 0x34d   : > { %3600 = vmatmul.mubr.msk.bf16.gmra.mrb[4].mxu1 %vm554_vm3, %v2431_v12 }
 0x34e   : > { %3603 = vmatprep.mubr.msk.bf16.mxu1 %vm554_vm3, %v2432_v53 }
 0x355   : > { %3604 = vmatmul.mubr.msk.bf16.gmra.mrb[8].mxu1 %vm554_vm3, %v2433_v17 }
 0x356   : > { %3607 = vmatprep.mubr.msk.bf16.mxu1 %vm554_vm3, %v2434_v63 }
 0x35d   : > { %3608 = vmatmul.mubr.msk.bf16.gmra.mrb[12].mxu1 %vm554_vm3, %v2435_v33 }
 0x35e   : > { %3611 = vmatprep.mubr.msk.bf16.mxu1 %vm554_vm3, %v2436_v61 }
 0x365   : > { %3612 = vmatmul.mubr.msk.bf16.gmra.mrb[16].mxu1 %vm554_vm3, %v2437_v5 }
 0x366   : > { %3615 = vmatprep.mubr.msk.bf16.mxu1 %vm554_vm3, %v2438_v51 }
 0x36d   : > { %3616 = vmatmul.mubr.msk.bf16.gmra.mrb[20].mxu1 %vm554_vm3, %v2439_v49 }
 0x36e   : > { %3619 = vmatprep.mubr.msk.bf16.mxu1 %vm554_vm3, %v2440_v28 }
 0x375   : > { %3620 = vmatmul.mubr.msk.bf16.gmra.mrb[24].mxu1 %vm554_vm3, %v2441_v58 }
 0x376   : > { %3623 = vmatprep.mubr.msk.bf16.mxu1 %vm554_vm3, %v2442_v50 }
 0x37d   : > { %3624 = vmatmul.mubr.msk.bf16.gmra.mrb[28].mxu1 %vm554_vm3, %v2443_v54 }
 0x418   : > { %v3597_v62 = vpop.f32.mrb[0].mxu1 }
 0x419   : > { %2699 = vst.msk [vmem:[#allocation3 + $0x10] sm:$0xff] %vm331_vm1, %v3597_v62  ;;  %v2537_v11 = vpop.f32.mrb[1].mxu1  ;;  %v2801_v42 = vmul.f32 %v3597_v62, %v3597_v62  ;;  %v2732_v40 = vsel %vm331_vm1, %v3597_v62, 0.0 }
 0x41a   : > { %2697 = vst.msk [vmem:[#allocation3] sm:$0xff] %vm331_vm1, %v2537_v11  ;;  %v2799_v30 = vmul.f32 %v2537_v11, %v2537_v11  ;;  %v3598_v44 = vpop.f32.mrb[2].mxu1  ;;  %v2729_v57 = vsel %vm331_vm1, %v2537_v11, 0.0 }
 0x41b   : > { %2700 = vst.msk [vmem:[#allocation3 + $0x18] sm:$0xff] %vm331_vm1, %v3598_v44  ;;  %v2540_v23 = vpop.f32.mrb[3].mxu1  ;;  %v2802_v19 = vmul.f32 %v3598_v44, %v3598_v44  ;;  %v2834_v31 = vsel %vm331_vm1, %v2801_v42, 0.0  ;;  %v2734_v22 = vsel %vm331_vm1, %v3598_v44, 0.0 }
 0x41c   : > { %2698 = vst.msk [vmem:[#allocation3 + $0x8] sm:$0xff] %vm331_vm1, %v2540_v23  ;;  %v2730_v34 = vsel %vm331_vm1, %v2540_v23, 0.0  ;;  %v2800_v21 = vmul.f32 %v2540_v23, %v2540_v23  ;;  %v2831_v36 = vsel %vm331_vm1, %v2799_v30, 0.0 }
 0x41d   : > { %v2731_v15 = vadd.f32 %v2730_v34, %v2729_v57  ;;  %v2836_v47 = vsel %vm331_vm1, %v2802_v19, 0.0 }
 0x41e   : > { %v2832_v4 = vsel %vm331_vm1, %v2800_v21, 0.0 }
 0x41f   : > { %v2733_v18 = vadd.f32 %v2732_v40, %v2731_v15  ;;  %v2833_v29 = vadd.f32 %v2832_v4, %v2831_v36 }
 0x420   : > { %v3601_v7 = vpop.f32.mrb[4].mxu1 }
 0x421   : > { %v2835_v9 = vadd.f32 %v2834_v31, %v2833_v29  ;;  %2703 = vst.msk [vmem:[#allocation3 + $0x30] sm:$0xff] %vm331_vm1, %v3601_v7  ;;  %v2553_v59 = vpop.f32.mrb[5].mxu1  ;;  %v2735_v8 = vadd.f32 %v2734_v22, %v2733_v18  ;;  %v2805_v26 = vmul.f32 %v3601_v7, %v3601_v7  ;;  %v2740_v38 = vsel %vm331_vm1, %v3601_v7, 0.0 }
 0x422   : > { %2701 = vst.msk [vmem:[#allocation3 + $0x20] sm:$0xff] %vm331_vm1, %v2553_v59  ;;  %v2736_v1 = vsel %vm331_vm1, %v2553_v59, 0.0  ;;  %v2803_v25 = vmul.f32 %v2553_v59, %v2553_v59  ;;  %v3602_v13 = vpop.f32.mrb[6].mxu1 }
 0x423   : > { %v2737_v55 = vadd.f32 %v2736_v1, %v2735_v8  ;;  %v2837_v16 = vadd.f32 %v2836_v47, %v2835_v9  ;;  %2704 = vst.msk [vmem:[#allocation3 + $0x38] sm:$0xff] %vm331_vm1, %v3602_v13  ;;  %v2556_v3 = vpop.f32.mrb[7].mxu1  ;;  %v2806_v17 = vmul.f32 %v3602_v13, %v3602_v13  ;;  %v2842_v52 = vsel %vm331_vm1, %v2805_v26, 0.0 }
 0x424   : > { %v2838_v12 = vsel %vm331_vm1, %v2803_v25, 0.0  ;;  %2702 = vst.msk [vmem:[#allocation3 + $0x28] sm:$0xff] %vm331_vm1, %v2556_v3  ;;  %v2738_v6 = vsel %vm331_vm1, %v2556_v3, 0.0  ;;  %v2804_v53 = vmul.f32 %v2556_v3, %v2556_v3  ;;  %v2742_v41 = vsel %vm331_vm1, %v3602_v13, 0.0 }
 0x425   : > { %v2839_v60 = vadd.f32 %v2838_v12, %v2837_v16  ;;  %v2739_v10 = vadd.f32 %v2738_v6, %v2737_v55  ;;  %v2844_v14 = vsel %vm331_vm1, %v2806_v17, 0.0 }
 0x426   : > { %v2840_v39 = vsel %vm331_vm1, %v2804_v53, 0.0 }
 0x427   : > { %v2741_v63 = vadd.f32 %v2740_v38, %v2739_v10  ;;  %v2841_v0 = vadd.f32 %v2840_v39, %v2839_v60 }
 0x428   : > { %v3605_v33 = vpop.f32.mrb[8].mxu1 }
 0x429   : > { %v2843_v56 = vadd.f32 %v2842_v52, %v2841_v0  ;;  %2707 = vst.msk [vmem:[#allocation3 + $0x50] sm:$0xff] %vm331_vm1, %v3605_v33  ;;  %v2569_v61 = vpop.f32.mrb[9].mxu1  ;;  %v2743_v24 = vadd.f32 %v2742_v41, %v2741_v63  ;;  %v2809_v46 = vmul.f32 %v3605_v33, %v3605_v33  ;;  %v2748_v27 = vsel %vm331_vm1, %v3605_v33, 0.0 }
 0x42a   : > { %2705 = vst.msk [vmem:[#allocation3 + $0x40] sm:$0xff] %vm331_vm1, %v2569_v61  ;;  %v2744_v45 = vsel %vm331_vm1, %v2569_v61, 0.0  ;;  %v2807_v5 = vmul.f32 %v2569_v61, %v2569_v61  ;;  %v3606_v48 = vpop.f32.mrb[10].mxu1 }
 0x42b   : > { %v2745_v51 = vadd.f32 %v2744_v45, %v2743_v24  ;;  %v2845_v20 = vadd.f32 %v2844_v14, %v2843_v56  ;;  %2708 = vst.msk [vmem:[#allocation3 + $0x58] sm:$0xff] %vm331_vm1, %v3606_v48  ;;  %v2572_v43 = vpop.f32.mrb[11].mxu1  ;;  %v2810_v58 = vmul.f32 %v3606_v48, %v3606_v48  ;;  %v2850_v62 = vsel %vm331_vm1, %v2809_v46, 0.0 }
 0x42c   : > { %v2846_v49 = vsel %vm331_vm1, %v2807_v5, 0.0  ;;  %2706 = vst.msk [vmem:[#allocation3 + $0x48] sm:$0xff] %vm331_vm1, %v2572_v43  ;;  %v2746_v32 = vsel %vm331_vm1, %v2572_v43, 0.0  ;;  %v2808_v28 = vmul.f32 %v2572_v43, %v2572_v43  ;;  %v2750_v11 = vsel %vm331_vm1, %v3606_v48, 0.0 }
 0x42d   : > { %v2847_v37 = vadd.f32 %v2846_v49, %v2845_v20  ;;  %v2747_v35 = vadd.f32 %v2746_v32, %v2745_v51  ;;  %v2852_v57 = vsel %vm331_vm1, %v2810_v58, 0.0 }
 0x42e   : > { %v2848_v50 = vsel %vm331_vm1, %v2808_v28, 0.0 }
 0x42f   : > { %v2749_v2 = vadd.f32 %v2748_v27, %v2747_v35  ;;  %v2849_v54 = vadd.f32 %v2848_v50, %v2847_v37 }
 0x430   : > { %v3609_v30 = vpop.f32.mrb[12].mxu1 }
 0x431   : > { %v2851_v44 = vadd.f32 %v2850_v62, %v2849_v54  ;;  %2711 = vst.msk [vmem:[#allocation3 + $0x70] sm:$0xff] %vm331_vm1, %v3609_v30  ;;  %v2585_v23 = vpop.f32.mrb[13].mxu1  ;;  %v2751_v42 = vadd.f32 %v2750_v11, %v2749_v2  ;;  %v2813_v4 = vmul.f32 %v3609_v30, %v3609_v30  ;;  %v2756_v9 = vsel %vm331_vm1, %v3609_v30, 0.0 }
 0x432   : > { %2709 = vst.msk [vmem:[#allocation3 + $0x60] sm:$0xff] %vm331_vm1, %v2585_v23  ;;  %v2752_v34 = vsel %vm331_vm1, %v2585_v23, 0.0  ;;  %v2811_v21 = vmul.f32 %v2585_v23, %v2585_v23  ;;  %v3610_v15 = vpop.f32.mrb[14].mxu1 }
 0x433   : > { %v2753_v40 = vadd.f32 %v2752_v34, %v2751_v42  ;;  %v2853_v36 = vadd.f32 %v2852_v57, %v2851_v44  ;;  %2712 = vst.msk [vmem:[#allocation3 + $0x78] sm:$0xff] %vm331_vm1, %v3610_v15  ;;  %v2588_v19 = vpop.f32.mrb[15].mxu1  ;;  %v2814_v59 = vmul.f32 %v3610_v15, %v3610_v15  ;;  %v2858_v25 = vsel %vm331_vm1, %v2813_v4, 0.0 }
 0x434   : > { %v2854_v18 = vsel %vm331_vm1, %v2811_v21, 0.0  ;;  %2710 = vst.msk [vmem:[#allocation3 + $0x68] sm:$0xff] %vm331_vm1, %v2588_v19  ;;  %v2754_v29 = vsel %vm331_vm1, %v2588_v19, 0.0  ;;  %v2812_v31 = vmul.f32 %v2588_v19, %v2588_v19  ;;  %v2758_v13 = vsel %vm331_vm1, %v3610_v15, 0.0 }
 0x435   : > { %v2855_v22 = vadd.f32 %v2854_v18, %v2853_v36  ;;  %v2755_v7 = vadd.f32 %v2754_v29, %v2753_v40  ;;  %v2860_v12 = vsel %vm331_vm1, %v2814_v59, 0.0 }
 0x436   : > { %v2856_v8 = vsel %vm331_vm1, %v2812_v31, 0.0 }
 0x437   : > { %v2757_v47 = vadd.f32 %v2756_v9, %v2755_v7  ;;  %v2857_v1 = vadd.f32 %v2856_v8, %v2855_v22 }
 0x438   : > { %v3613_v55 = vpop.f32.mrb[16].mxu1 }
 0x439   : > { %v2859_v16 = vadd.f32 %v2858_v25, %v2857_v1  ;;  %2715 = vst.msk [vmem:[#allocation3 + $0x90] sm:$0xff] %vm331_vm1, %v3613_v55  ;;  %v2601_v3 = vpop.f32.mrb[17].mxu1  ;;  %v2759_v26 = vadd.f32 %v2758_v13, %v2757_v47  ;;  %v2817_v39 = vmul.f32 %v3613_v55, %v3613_v55  ;;  %v2764_v56 = vsel %vm331_vm1, %v3613_v55, 0.0 }
 0x43a   : > { %2713 = vst.msk [vmem:[#allocation3 + $0x80] sm:$0xff] %vm331_vm1, %v2601_v3  ;;  %v2760_v6 = vsel %vm331_vm1, %v2601_v3, 0.0  ;;  %v2815_v53 = vmul.f32 %v2601_v3, %v2601_v3  ;;  %v3614_v60 = vpop.f32.mrb[18].mxu1 }
 0x43b   : > { %v2761_v10 = vadd.f32 %v2760_v6, %v2759_v26  ;;  %v2861_v38 = vadd.f32 %v2860_v12, %v2859_v16  ;;  %2716 = vst.msk [vmem:[#allocation3 + $0x98] sm:$0xff] %vm331_vm1, %v3614_v60  ;;  %v2604_v17 = vpop.f32.mrb[19].mxu1  ;;  %v2818_v61 = vmul.f32 %v3614_v60, %v3614_v60  ;;  %v2866_v5 = vsel %vm331_vm1, %v2817_v39, 0.0 }
 0x43c   : > { %v2862_v63 = vsel %vm331_vm1, %v2815_v53, 0.0  ;;  %2714 = vst.msk [vmem:[#allocation3 + $0x88] sm:$0xff] %vm331_vm1, %v2604_v17  ;;  %v2762_v0 = vsel %vm331_vm1, %v2604_v17, 0.0  ;;  %v2816_v52 = vmul.f32 %v2604_v17, %v2604_v17  ;;  %v2766_v48 = vsel %vm331_vm1, %v3614_v60, 0.0 }
 0x43d   : > { %v2863_v41 = vadd.f32 %v2862_v63, %v2861_v38  ;;  %v2763_v33 = vadd.f32 %v2762_v0, %v2761_v10  ;;  %v2868_v49 = vsel %vm331_vm1, %v2818_v61, 0.0 }
 0x43e   : > { %v2864_v24 = vsel %vm331_vm1, %v2816_v52, 0.0 }
 0x43f   : > { %v2765_v14 = vadd.f32 %v2764_v56, %v2763_v33  ;;  %v2865_v45 = vadd.f32 %v2864_v24, %v2863_v41 }
 0x440   : > { %v3617_v51 = vpop.f32.mrb[20].mxu1 }
 0x441   : > { %v2867_v20 = vadd.f32 %v2866_v5, %v2865_v45  ;;  %2719 = vst.msk [vmem:[#allocation3 + $0xb0] sm:$0xff] %vm331_vm1, %v3617_v51  ;;  %v2617_v43 = vpop.f32.mrb[21].mxu1  ;;  %v2767_v46 = vadd.f32 %v2766_v48, %v2765_v14  ;;  %v2821_v50 = vmul.f32 %v3617_v51, %v3617_v51  ;;  %v2772_v44 = vsel %vm331_vm1, %v3617_v51, 0.0 }
 0x442   : > { %2717 = vst.msk [vmem:[#allocation3 + $0xa0] sm:$0xff] %vm331_vm1, %v2617_v43  ;;  %v2768_v32 = vsel %vm331_vm1, %v2617_v43, 0.0  ;;  %v2819_v28 = vmul.f32 %v2617_v43, %v2617_v43  ;;  %v3618_v37 = vpop.f32.mrb[22].mxu1 }
 0x443   : > { %v2769_v35 = vadd.f32 %v2768_v32, %v2767_v46  ;;  %v2869_v27 = vadd.f32 %v2868_v49, %v2867_v20  ;;  %2720 = vst.msk [vmem:[#allocation3 + $0xb8] sm:$0xff] %vm331_vm1, %v3618_v37  ;;  %v2620_v58 = vpop.f32.mrb[23].mxu1  ;;  %v2822_v23 = vmul.f32 %v3618_v37, %v3618_v37  ;;  %v2874_v21 = vsel %vm331_vm1, %v2821_v50, 0.0 }
 0x444   : > { %v2870_v2 = vsel %vm331_vm1, %v2819_v28, 0.0  ;;  %2718 = vst.msk [vmem:[#allocation3 + $0xa8] sm:$0xff] %vm331_vm1, %v2620_v58  ;;  %v2770_v54 = vsel %vm331_vm1, %v2620_v58, 0.0  ;;  %v2820_v62 = vmul.f32 %v2620_v58, %v2620_v58  ;;  %v2774_v15 = vsel %vm331_vm1, %v3618_v37, 0.0 }
 0x445   : > { %v2871_v11 = vadd.f32 %v2870_v2, %v2869_v27  ;;  %v2771_v30 = vadd.f32 %v2770_v54, %v2769_v35  ;;  %v2876_v18 = vsel %vm331_vm1, %v2822_v23, 0.0 }
 0x446   : > { %v2872_v42 = vsel %vm331_vm1, %v2820_v62, 0.0 }
 0x447   : > { %v2773_v57 = vadd.f32 %v2772_v44, %v2771_v30  ;;  %v2873_v34 = vadd.f32 %v2872_v42, %v2871_v11 }
 0x448   : > { %v3621_v40 = vpop.f32.mrb[24].mxu1 }
 0x449   : > { %v2875_v36 = vadd.f32 %v2874_v21, %v2873_v34  ;;  %2723 = vst.msk [vmem:[#allocation3 + $0xd0] sm:$0xff] %vm331_vm1, %v3621_v40  ;;  %v2633_v19 = vpop.f32.mrb[25].mxu1  ;;  %v2775_v4 = vadd.f32 %v2774_v15, %v2773_v57  ;;  %v2825_v8 = vmul.f32 %v3621_v40, %v3621_v40  ;;  %v2780_v16 = vsel %vm331_vm1, %v3621_v40, 0.0 }
 0x44a   : > { %2721 = vst.msk [vmem:[#allocation3 + $0xc0] sm:$0xff] %vm331_vm1, %v2633_v19  ;;  %v2776_v29 = vsel %vm331_vm1, %v2633_v19, 0.0  ;;  %v2823_v31 = vmul.f32 %v2633_v19, %v2633_v19  ;;  %v3622_v22 = vpop.f32.mrb[26].mxu1 }
 0x44b   : > { %v2777_v7 = vadd.f32 %v2776_v29, %v2775_v4  ;;  %v2877_v9 = vadd.f32 %v2876_v18, %v2875_v36  ;;  %2724 = vst.msk [vmem:[#allocation3 + $0xd8] sm:$0xff] %vm331_vm1, %v3622_v22  ;;  %v2636_v59 = vpop.f32.mrb[27].mxu1  ;;  %v2826_v3 = vmul.f32 %v3622_v22, %v3622_v22  ;;  %v2882_v53 = vsel %vm331_vm1, %v2825_v8, 0.0  ;;  %v5272_v8 = vld [vmem:[#allocation3 + $0x20] sm:$0xff] }
 0x44c   : > { %v2878_v47 = vsel %vm331_vm1, %v2823_v31, 0.0  ;;  %2722 = vst.msk [vmem:[#allocation3 + $0xc8] sm:$0xff] %vm331_vm1, %v2636_v59  ;;  %v2778_v1 = vsel %vm331_vm1, %v2636_v59, 0.0  ;;  %v2824_v25 = vmul.f32 %v2636_v59, %v2636_v59  ;;  %v2782_v60 = vsel %vm331_vm1, %v3622_v22, 0.0  ;;  %v5262_v31 = vld [vmem:[#allocation3 + $0x10] sm:$0xff]  ;;  %v5264_v22 = vld [vmem:[#allocation3] sm:$0xff] }
 0x44d   : > { %v2879_v13 = vadd.f32 %v2878_v47, %v2877_v9  ;;  %v2779_v55 = vadd.f32 %v2778_v1, %v2777_v7  ;;  %v2884_v63 = vsel %vm331_vm1, %v2826_v3, 0.0  ;;  %v5266_v7 = vld [vmem:[#allocation3 + $0x18] sm:$0xff]  ;;  %v5268_v9 = vld [vmem:[#allocation3 + $0x8] sm:$0xff]  ;;  %v5270_v59 = vld [vmem:[#allocation3 + $0x30] sm:$0xff] }
 0x44e   : > { %v2880_v26 = vsel %vm331_vm1, %v2824_v25, 0.0  ;;  %v5274_v47 = vld [vmem:[#allocation3 + $0x38] sm:$0xff]  ;;  %v5276_v1 = vld [vmem:[#allocation3 + $0x28] sm:$0xff]  ;;  %v5278_v25 = vld [vmem:[#allocation3 + $0x50] sm:$0xff] }
 0x44f   : > { %v2781_v12 = vadd.f32 %v2780_v16, %v2779_v55  ;;  %v2881_v6 = vadd.f32 %v2880_v26, %v2879_v13  ;;  %v5280_v13 = vld [vmem:[#allocation3 + $0x40] sm:$0xff]  ;;  %v5282_v55 = vld [vmem:[#allocation3 + $0x58] sm:$0xff]  ;;  %v5284_v16 = vld [vmem:[#allocation3 + $0x48] sm:$0xff] }
 0x450   : > { %v3625_v10 = vpop.f32.mrb[28].mxu1  ;;  %v5286_v3 = vld [vmem:[#allocation3 + $0x70] sm:$0xff]  ;;  %v5288_v26 = vld [vmem:[#allocation3 + $0x60] sm:$0xff] }
 0x451   : > { %v2883_v38 = vadd.f32 %v2882_v53, %v2881_v6  ;;  %2727 = vst.msk [vmem:[#allocation3 + $0xf0] sm:$0xff] %vm331_vm1, %v3625_v10  ;;  %v2649_v17 = vpop.f32.mrb[29].mxu1  ;;  %v2783_v39 = vadd.f32 %v2782_v60, %v2781_v12  ;;  %v2829_v24 = vmul.f32 %v3625_v10, %v3625_v10  ;;  %v2788_v20 = vsel %vm331_vm1, %v3625_v10, 0.0  ;;  %v5298_v10 = vld [vmem:[#allocation3 + $0x78] sm:$0xff] }
 0x452   : > { %2725 = vst.msk [vmem:[#allocation3 + $0xe0] sm:$0xff] %vm331_vm1, %v2649_v17  ;;  %v2784_v0 = vsel %vm331_vm1, %v2649_v17, 0.0  ;;  %v2827_v52 = vmul.f32 %v2649_v17, %v2649_v17  ;;  %v3626_v41 = vpop.f32.mrb[30].mxu1  ;;  %v5300_v17 = vld [vmem:[#allocation3 + $0x90] sm:$0xff] }
 0x453   : > { %v2785_v33 = vadd.f32 %v2784_v0, %v2783_v39  ;;  %v2885_v56 = vadd.f32 %v2884_v63, %v2883_v38  ;;  %2728 = vst.msk [vmem:[#allocation3 + $0xf8] sm:$0xff] %vm331_vm1, %v3626_v41  ;;  %v2652_v61 = vpop.f32.mrb[31].mxu1  ;;  %v2830_v43 = vmul.f32 %v3626_v41, %v3626_v41  ;;  %v2890_v28 = vsel %vm331_vm1, %v2829_v24, 0.0  ;;  %v2921_v38 = vld [vmem:[#allocation3 + $0x68] sm:$0xff] }
 0x454   : > { %v2886_v14 = vsel %vm331_vm1, %v2827_v52, 0.0  ;;  %2726 = vst.msk [vmem:[#allocation3 + $0xe8] sm:$0xff] %vm331_vm1, %v2652_v61  ;;  %v2786_v45 = vsel %vm331_vm1, %v2652_v61, 0.0  ;;  %v2828_v5 = vmul.f32 %v2652_v61, %v2652_v61  ;;  %v2790_v37 = vsel %vm331_vm1, %v3626_v41, 0.0  ;;  %v2924_v41 = vld [vmem:[#allocation3 + $0x80] sm:$0xff] }
 0x455   : > { %v2887_v48 = vadd.f32 %v2886_v14, %v2885_v56  ;;  %v2787_v51 = vadd.f32 %v2786_v45, %v2785_v33  ;;  %v2892_v58 = vsel %vm331_vm1, %v2830_v43, 0.0  ;;  %v2927_v33 = vld [vmem:[#allocation3 + $0x98] sm:$0xff]  ;;  %v2925_v56 = vld [vmem:[#allocation3 + $0x88] sm:$0xff] }
 0x456   : > { %v2888_v46 = vsel %vm331_vm1, %v2828_v5, 0.0  ;;  %v2930_v5 = vld [vmem:[#allocation3 + $0xb0] sm:$0xff] }
 0x457   : > { %v2789_v49 = vadd.f32 %v2788_v20, %v2787_v51  ;;  %v2889_v32 = vadd.f32 %v2888_v46, %v2887_v48  ;;  %v2928_v48 = vld [vmem:[#allocation3 + $0xa0] sm:$0xff]  ;;  %v2931_v51 = vld [vmem:[#allocation3 + $0xb8] sm:$0xff] }
 0x459   : > { %v2791_v35 = vadd.f32 %v2790_v37, %v2789_v49  ;;  %v2891_v27 = vadd.f32 %v2890_v28, %v2889_v32  ;;  %v2929_v32 = vld [vmem:[#allocation3 + $0xa8] sm:$0xff]  ;;  %v2934_v28 = vld [vmem:[#allocation3 + $0xd0] sm:$0xff]  ;;  %v2932_v37 = vld [vmem:[#allocation3 + $0xc0] sm:$0xff] }
 0x45b   : > { %v2792_v50 = vrot.slane %v2791_v35, 4  ;;  %v2893_v2 = vadd.f32 %v2892_v58, %v2891_v27 }
 0x45d   : > { %v2793_v54 = vadd.f32 %v2792_v50, %v2791_v35  ;;  %v2894_v62 = vrot.slane %v2893_v2, 4 }
 0x45f   : > { %v2794_v11 = vrot.slane %v2793_v54, 2  ;;  %v2895_v30 = vadd.f32 %v2894_v62, %v2893_v2  ;;  %v2935_v2 = vld [vmem:[#allocation3 + $0xd8] sm:$0xff]  ;;  %v2938_v62 = vld [vmem:[#allocation3 + $0xf0] sm:$0xff] }
 0x461   : > { %v2795_v44 = vadd.f32 %v2794_v11, %v2793_v54  ;;  %v2896_v23 = vrot.slane %v2895_v30, 2  ;;  %v2933_v54 = vld [vmem:[#allocation3 + $0xc8] sm:$0xff] }
 0x463   : > { %v2796_v42 = vrot.slane %v2795_v44, 1  ;;  %v2897_v57 = vadd.f32 %v2896_v23, %v2895_v30 }
 0x465   : > { %v2797_v34 = vadd.f32 %v2796_v42, %v2795_v44  ;;  %v2898_v21 = vrot.slane %v2897_v57, 1  ;;  %v2936_v42 = vld [vmem:[#allocation3 + $0xe0] sm:$0xff] }
 0x467   : > { %v2899_v15 = vadd.f32 %v2898_v21, %v2897_v57  ;;  %v5258_v40 = vmul.f32 0.00390625, %v2797_v34  ;;  %v2939_v57 = vld [vmem:[#allocation3 + $0xf8] sm:$0xff]  ;;  %v2937_v34 = vld [vmem:[#allocation3 + $0xe8] sm:$0xff] }
 0x469   : > { %v2902_v36 = vmul.f32 0.00390625, %v2899_v15  ;;  %v2903_v19 = vmul.f32 %v5258_v40, %v5258_v40  ;;  %v2940_v12 = vsub.f32 %v5264_v22, %v5258_v40  ;;  %v2941_v6 = vsub.f32 %v5268_v9, %v5258_v40 }
 0x46a   : > { %v2942_v53 = vsub.f32 %v5262_v31, %v5258_v40  ;;  %v2943_v60 = vsub.f32 %v5266_v7, %v5258_v40  ;;  %v2944_v39 = vsub.f32 %v5272_v8, %v5258_v40  ;;  %v2945_v63 = vsub.f32 %v5276_v1, %v5258_v40 }
 0x46b   : > { %v2904_v4 = vsub.f32 %v2902_v36, %v2903_v19  ;;  %v2946_v0 = vsub.f32 %v5270_v59, %v5258_v40  ;;  %v2947_v52 = vsub.f32 %v5274_v47, %v5258_v40  ;;  %v2948_v61 = vsub.f32 %v5280_v13, %v5258_v40 }
 0x46c   : > { %v2949_v24 = vsub.f32 %v5284_v16, %v5258_v40  ;;  %v2950_v14 = vsub.f32 %v5278_v25, %v5258_v40  ;;  %v2951_v45 = vsub.f32 %v5282_v55, %v5258_v40  ;;  %v2952_v20 = vsub.f32 %v5288_v26, %v5258_v40 }
 0x46d   : > { %v2905_v18 = vmax.f32 %v2904_v4, 0.0  ;;  %v2953_v43 = vsub.f32 %v2921_v38, %v5258_v40  ;;  %v2954_v46 = vsub.f32 %v5286_v3, %v5258_v40  ;;  %v2955_v49 = vsub.f32 %v5298_v10, %v5258_v40 }
 0x46e   : > { %v2956_v35 = vsub.f32 %v2924_v41, %v5258_v40  ;;  %v2957_v27 = vsub.f32 %v2925_v56, %v5258_v40  ;;  %v2958_v58 = vsub.f32 %v5300_v17, %v5258_v40  ;;  %v2959_v50 = vsub.f32 %v2927_v33, %v5258_v40 }
 0x46f   : > { %v2906_v29 = vadd.f32 1e-05, %v2905_v18  ;;  %v2960_v11 = vsub.f32 %v2928_v48, %v5258_v40  ;;  %v2961_v30 = vsub.f32 %v2929_v32, %v5258_v40  ;;  %v2962_v44 = vsub.f32 %v2930_v5, %v5258_v40 }
 0x470   : > { %v2963_v23 = vsub.f32 %v2931_v51, %v5258_v40  ;;  %v2964_v21 = vsub.f32 %v2932_v37, %v5258_v40  ;;  %v2965_v15 = vsub.f32 %v2933_v54, %v5258_v40  ;;  %v2966_v36 = vsub.f32 %v2934_v28, %v5258_v40 }
 0x471   : > { %3780 = vrsqrt.f32 %v2906_v29  ;;  %v2967_v19 = vsub.f32 %v2935_v2, %v5258_v40  ;;  %v2968_v18 = vsub.f32 %v2936_v42, %v5258_v40  ;;  %v2969_v29 = vsub.f32 %v2937_v34, %v5258_v40 }
 0x472   : > { %v2970_v31 = vsub.f32 %v2938_v62, %v5258_v40  ;;  %v2971_v22 = vsub.f32 %v2939_v57, %v5258_v40 }
 0x47b   : > { %v3781_v4 = vpop.eup %3780 }
 0x47c   : > { %v5342_v7 = vmul.f32 %v3781_v4, %v2940_v12  ;;  %v5344_v9 = vmul.f32 %v3781_v4, %v2941_v6  ;;  %v5346_v59 = vmul.f32 %v3781_v4, %v2942_v53  ;;  %v5348_v8 = vmul.f32 %v3781_v4, %v2943_v60 }
 0x47d   : > { %v5350_v47 = vmul.f32 %v3781_v4, %v2944_v39  ;;  %v5352_v1 = vmul.f32 %v3781_v4, %v2945_v63  ;;  %v5354_v25 = vmul.f32 %v3781_v4, %v2946_v0  ;;  %v5356_v13 = vmul.f32 %v3781_v4, %v2947_v52 }
 0x47e   : > { %v5358_v55 = vmul.f32 %v3781_v4, %v2948_v61  ;;  %v5360_v16 = vmul.f32 %v3781_v4, %v2949_v24  ;;  %v5362_v40 = vmul.f32 %v3781_v4, %v2950_v14  ;;  %v5364_v3 = vmul.f32 %v3781_v4, %v2951_v45 }
 0x47f   : > { %v5366_v26 = vmul.f32 %v3781_v4, %v2952_v20  ;;  %v5368_v12 = vmul.f32 %v3781_v4, %v2953_v43  ;;  %v5370_v6 = vmul.f32 %v3781_v4, %v2954_v46  ;;  %v5372_v53 = vmul.f32 %v3781_v4, %v2955_v49 }
 0x480   : > { %v5374_v60 = vmul.f32 %v3781_v4, %v2956_v35  ;;  %v5376_v10 = vmul.f32 %v3781_v4, %v2957_v27  ;;  %v5378_v38 = vmul.f32 %v3781_v4, %v2958_v58  ;;  %v5380_v17 = vmul.f32 %v3781_v4, %v2959_v50  ;;  %v3059_v50 = vld [vmem:[%s3839_s21 + $0xb8] sm:$0xff] }
 0x481   : > { %v5382_v39 = vmul.f32 %v3781_v4, %v2960_v11  ;;  %v5384_v63 = vmul.f32 %v3781_v4, %v2961_v30  ;;  %v5386_v0 = vmul.f32 %v3781_v4, %v2962_v44  ;;  %v5388_v52 = vmul.f32 %v3781_v4, %v2963_v23  ;;  %v3036_v11 = vld [vmem:[%s3839_s21] sm:$0xff]  ;;  %v3037_v30 = vld [vmem:[%s3839_s21 + $0x8] sm:$0xff]  ;;  %v3038_v44 = vld [vmem:[%s3839_s21 + $0x10] sm:$0xff] }
 0x482   : > { %v5390_v41 = vmul.f32 %v3781_v4, %v2964_v21  ;;  %v5392_v33 = vmul.f32 %v3781_v4, %v2965_v15  ;;  %v5394_v56 = vmul.f32 %v3781_v4, %v2966_v36  ;;  %v5396_v61 = vmul.f32 %v3781_v4, %v2967_v19  ;;  %v3039_v23 = vld [vmem:[%s3839_s21 + $0x18] sm:$0xff]  ;;  %v3040_v15 = vld [vmem:[%s3839_s21 + $0x20] sm:$0xff]  ;;  %v3041_v36 = vld [vmem:[%s3839_s21 + $0x28] sm:$0xff] }
 0x483   : > { %v5398_v24 = vmul.f32 %v3781_v4, %v2968_v18  ;;  %v5400_v14 = vmul.f32 %v3781_v4, %v2969_v29  ;;  %v5402_v45 = vmul.f32 %v3781_v4, %v2970_v31  ;;  %v5404_v5 = vmul.f32 %v3781_v4, %v2971_v22  ;;  %v3042_v19 = vld [vmem:[%s3839_s21 + $0x30] sm:$0xff]  ;;  %v3043_v4 = vld [vmem:[%s3839_s21 + $0x38] sm:$0xff]  ;;  %v3052_v22 = vld [vmem:[%s3839_s21 + $0x80] sm:$0xff] }
 0x484   : > { %v3004_v48 = vmax.f32 %v5342_v7, 0.0  ;;  %v3005_v51 = vmax.f32 %v5344_v9, 0.0  ;;  %v3006_v20 = vmax.f32 %v5346_v59, 0.0  ;;  %v3007_v43 = vmax.f32 %v5348_v8, 0.0  ;;  %v3044_v7 = vld [vmem:[%s3839_s21 + $0x40] sm:$0xff]  ;;  %v3045_v9 = vld [vmem:[%s3839_s21 + $0x48] sm:$0xff] }
 0x485   : > { %5605 = vst [vmem:[#allocation4_spill] sm:$0xff] %v5404_v5  ;;  %v3008_v46 = vmax.f32 %v5350_v47, 0.0  ;;  %v3009_v49 = vmax.f32 %v5352_v1, 0.0  ;;  %v3010_v32 = vmax.f32 %v5354_v25, 0.0  ;;  %v3011_v28 = vmax.f32 %v5356_v13, 0.0  ;;  %v3046_v59 = vld [vmem:[%s3839_s21 + $0x50] sm:$0xff] }
 0x486   : > { %v3012_v37 = vmax.f32 %v5358_v55, 0.0  ;;  %v3013_v35 = vmax.f32 %v5360_v16, 0.0  ;;  %v3014_v27 = vmax.f32 %v5362_v40, 0.0  ;;  %v3015_v58 = vmax.f32 %v5364_v3, 0.0  ;;  %v3047_v8 = vld [vmem:[%s3839_s21 + $0x58] sm:$0xff]  ;;  %v3048_v55 = vld [vmem:[%s3839_s21 + $0x60] sm:$0xff] }
 0x487   : > { %v3049_v16 = vld [vmem:[%s3839_s21 + $0x68] sm:$0xff]  ;;  %v3050_v40 = vld [vmem:[%s3839_s21 + $0x70] sm:$0xff]  ;;  %v3051_v47 = vld [vmem:[%s3839_s21 + $0x78] sm:$0xff]  ;;  %v3068_v21 = vadd.f32 %v3036_v11, %v3004_v48  ;;  %v3069_v34 = vadd.f32 %v3037_v30, %v3005_v51  ;;  %v3070_v57 = vadd.f32 %v3038_v44, %v3006_v20  ;;  %v3071_v42 = vadd.f32 %v3039_v23, %v3007_v43 }
 0x488   : > { %v3053_v31 = vld [vmem:[%s3839_s21 + $0x88] sm:$0xff]  ;;  %v3054_v29 = vld [vmem:[%s3839_s21 + $0x90] sm:$0xff]  ;;  %v3055_v18 = vld [vmem:[%s3839_s21 + $0x98] sm:$0xff]  ;;  %v3072_v13 = vadd.f32 %v3040_v15, %v3008_v46  ;;  %v3073_v62 = vadd.f32 %v3041_v36, %v3009_v49  ;;  %v3074_v54 = vadd.f32 %v3042_v19, %v3010_v32  ;;  %v3075_v2 = vadd.f32 %v3043_v4, %v3011_v28 }
 0x489   : > { %v3056_v3 = vld [vmem:[%s3839_s21 + $0xa0] sm:$0xff]  ;;  %v3057_v1 = vld [vmem:[%s3839_s21 + $0xa8] sm:$0xff]  ;;  %v3058_v25 = vld [vmem:[%s3839_s21 + $0xb0] sm:$0xff]  ;;  %v3076_v51 = vadd.f32 %v3044_v7, %v3012_v37  ;;  %v3077_v20 = vadd.f32 %v3045_v9, %v3013_v35  ;;  %v3078_v43 = vadd.f32 %v3046_v59, %v3014_v27  ;;  %v3079_v11 = vadd.f32 %v3047_v8, %v3015_v58  ;;  %3101 = vst.msk [vmem:[%s5454_s7] sm:$0xff] %vm331_vm1, %v3068_v21 }
 0x48a   : > { %v3060_v5 = vld [vmem:[%s3839_s21 + $0xc0] sm:$0xff]  ;;  %v3061_v48 = vld [vmem:[%s3839_s21 + $0xc8] sm:$0xff]  ;;  %3102 = vst.msk [vmem:[%s5454_s7 + $0x8] sm:$0xff] %vm331_vm1, %v3069_v34  ;;  %3103 = vst.msk [vmem:[%s5454_s7 + $0x10] sm:$0xff] %vm331_vm1, %v3070_v57  ;;  %v5606_v28 = vmax.f32 %v5366_v26, 0.0  ;;  %v5607_v35 = vmax.f32 %v5368_v12, 0.0 }
 0x48b   : > { %3104 = vst.msk [vmem:[%s5454_s7 + $0x18] sm:$0xff] %vm331_vm1, %v3071_v42  ;;  %v3062_v46 = vld [vmem:[%s3839_s21 + $0xd0] sm:$0xff]  ;;  %v3063_v49 = vld [vmem:[%s3839_s21 + $0xd8] sm:$0xff]  ;;  %v3064_v32 = vld [vmem:[%s3839_s21 + $0xe0] sm:$0xff]  ;;  %v5608_v58 = vmax.f32 %v5370_v6, 0.0  ;;  %v5609_v44 = vmax.f32 %v5372_v53, 0.0 }
 0x48c   : > { %v3080_v37 = vadd.f32 %v3048_v55, %v5606_v28  ;;  %v3081_v27 = vadd.f32 %v3049_v16, %v5607_v35  ;;  %3105 = vst.msk [vmem:[%s5454_s7 + $0x20] sm:$0xff] %vm331_vm1, %v3072_v13  ;;  %3106 = vst.msk [vmem:[%s5454_s7 + $0x28] sm:$0xff] %vm331_vm1, %v3073_v62  ;;  %v3065_v26 = vld [vmem:[%s3839_s21 + $0xe8] sm:$0xff]  ;;  %v3066_v12 = vld [vmem:[%s3839_s21 + $0xf0] sm:$0xff]  ;;  %v5610_v42 = vmax.f32 %v5374_v60, 0.0  ;;  %v5611_v57 = vmax.f32 %v5376_v10, 0.0 }
 0x48d   : > { %v3082_v30 = vadd.f32 %v3050_v40, %v5608_v58  ;;  %v3083_v23 = vadd.f32 %v3051_v47, %v5609_v44  ;;  %3107 = vst.msk [vmem:[%s5454_s7 + $0x30] sm:$0xff] %vm331_vm1, %v3074_v54  ;;  %3108 = vst.msk [vmem:[%s5454_s7 + $0x38] sm:$0xff] %vm331_vm1, %v3075_v2  ;;  %v3067_v6 = vld [vmem:[%s3839_s21 + $0xf8] sm:$0xff]  ;;  %v5612_v21 = vmax.f32 %v5378_v38, 0.0  ;;  %v5613_v54 = vmax.f32 %v5380_v17, 0.0  ;;  %v5625_v7 = vld [vmem:[#allocation4_spill] sm:$0xff] }
 0x48e   : > { %v3084_v53 = vadd.f32 %v3052_v22, %v5610_v42  ;;  %v3085_v34 = vadd.f32 %v3053_v31, %v5611_v57  ;;  %3109 = vst.msk [vmem:[%s5454_s7 + $0x40] sm:$0xff] %vm331_vm1, %v3076_v51  ;;  %3110 = vst.msk [vmem:[%s5454_s7 + $0x48] sm:$0xff] %vm331_vm1, %v3077_v20  ;;  %v5614_v60 = vmax.f32 %v5382_v39, 0.0  ;;  %v5615_v38 = vmax.f32 %v5384_v63, 0.0 }
 0x48f   : > { %v3086_v62 = vadd.f32 %v3054_v29, %v5612_v21  ;;  %v3087_v15 = vadd.f32 %v3055_v18, %v5613_v54  ;;  %3111 = vst.msk [vmem:[%s5454_s7 + $0x50] sm:$0xff] %vm331_vm1, %v3078_v43  ;;  %3112 = vst.msk [vmem:[%s5454_s7 + $0x58] sm:$0xff] %vm331_vm1, %v3079_v11  ;;  %v5616_v17 = vmax.f32 %v5386_v0, 0.0  ;;  %v5617_v19 = vmax.f32 %v5388_v52, 0.0 }
 0x490   : > { %v3088_v10 = vadd.f32 %v3056_v3, %v5614_v60  ;;  %v3089_v2 = vadd.f32 %v3057_v1, %v5615_v38  ;;  %3113 = vst.msk [vmem:[%s5454_s7 + $0x60] sm:$0xff] %vm331_vm1, %v3080_v37  ;;  %3114 = vst.msk [vmem:[%s5454_s7 + $0x68] sm:$0xff] %vm331_vm1, %v3081_v27  ;;  %v5618_v39 = vmax.f32 %v5390_v41, 0.0  ;;  %v5619_v0 = vmax.f32 %v5392_v33, 0.0 }
 0x491   : > { %v3090_v36 = vadd.f32 %v3058_v25, %v5616_v17  ;;  %v3091_v4 = vadd.f32 %v3059_v50, %v5617_v19  ;;  %3115 = vst.msk [vmem:[%s5454_s7 + $0x70] sm:$0xff] %vm331_vm1, %v3082_v30  ;;  %3116 = vst.msk [vmem:[%s5454_s7 + $0x78] sm:$0xff] %vm331_vm1, %v3083_v23  ;;  %v5620_v50 = vmax.f32 %v5394_v56, 0.0  ;;  %v5621_v29 = vmax.f32 %v5396_v61, 0.0 }
 0x492   : > { %v3092_v63 = vadd.f32 %v3060_v5, %v5618_v39  ;;  %v3093_v52 = vadd.f32 %v3061_v48, %v5619_v0  ;;  %3117 = vst.msk [vmem:[%s5454_s7 + $0x80] sm:$0xff] %vm331_vm1, %v3084_v53  ;;  %3118 = vst.msk [vmem:[%s5454_s7 + $0x88] sm:$0xff] %vm331_vm1, %v3085_v34  ;;  %v5622_v41 = vmax.f32 %v5398_v24, 0.0  ;;  %v5623_v56 = vmax.f32 %v5400_v14, 0.0 }
 0x493   : > { %v3094_v18 = vadd.f32 %v3062_v46, %v5620_v50  ;;  %v3095_v31 = vadd.f32 %v3063_v49, %v5621_v29  ;;  %3119 = vst.msk [vmem:[%s5454_s7 + $0x90] sm:$0xff] %vm331_vm1, %v3086_v62  ;;  %3120 = vst.msk [vmem:[%s5454_s7 + $0x98] sm:$0xff] %vm331_vm1, %v3087_v15  ;;  %v5624_v5 = vmax.f32 %v5402_v45, 0.0  ;;  %v5626_v9 = vmax.f32 %v5625_v7, 0.0 }
 0x494   : > { %v3096_v33 = vadd.f32 %v3064_v32, %v5622_v41  ;;  %v3097_v61 = vadd.f32 %v3065_v26, %v5623_v56  ;;  %3121 = vst.msk [vmem:[%s5454_s7 + $0xa0] sm:$0xff] %vm331_vm1, %v3088_v10  ;;  %3122 = vst.msk [vmem:[%s5454_s7 + $0xa8] sm:$0xff] %vm331_vm1, %v3089_v2 }
 0x495   : > { %v3098_v22 = vadd.f32 %v3066_v12, %v5624_v5  ;;  %v3099_v59 = vadd.f32 %v3067_v6, %v5626_v9  ;;  %3123 = vst.msk [vmem:[%s5454_s7 + $0xb0] sm:$0xff] %vm331_vm1, %v3090_v36  ;;  %3124 = vst.msk [vmem:[%s5454_s7 + $0xb8] sm:$0xff] %vm331_vm1, %v3091_v4 }
 0x496   : > { %3125 = vst.msk [vmem:[%s5454_s7 + $0xc0] sm:$0xff] %vm331_vm1, %v3092_v63  ;;  %3126 = vst.msk [vmem:[%s5454_s7 + $0xc8] sm:$0xff] %vm331_vm1, %v3093_v52 }
 0x497   : > { %3127 = vst.msk [vmem:[%s5454_s7 + $0xd0] sm:$0xff] %vm331_vm1, %v3094_v18  ;;  %3128 = vst.msk [vmem:[%s5454_s7 + $0xd8] sm:$0xff] %vm331_vm1, %v3095_v31 }
 0x498   : > { %3129 = vst.msk [vmem:[%s5454_s7 + $0xe0] sm:$0xff] %vm331_vm1, %v3096_v33  ;;  %3130 = vst.msk [vmem:[%s5454_s7 + $0xe8] sm:$0xff] %vm331_vm1, %v3097_v61 }
 0x499   : > { %3131 = vst.msk [vmem:[%s5454_s7 + $0xf0] sm:$0xff] %vm331_vm1, %v3098_v22  ;;  %3132 = vst.msk [vmem:[%s5454_s7 + $0xf8] sm:$0xff] %vm331_vm1, %v3099_v59 }
 0x49a PF: > { %s13_s12 = sadd.s32 1, %s3788_s12  }
 0x49b   : > { %p10_p4 = scmp.ge.s32.totalorder %s13_s12, 4  }
 0x49d   :  { %12 = sbr.rel (!%p10_p4) target bundleno = 1 (0x1), region = 74 }

</bundles_post_ra>
